<compile_context>
chip_gen: v6e
topology: v6e:2x2x1
jax: 0.10.0
libtpu: 0.0.40
codegen_flags: <defaults>
</compile_context>

<pallas_src>
import functools
import math

import jax
import jax.numpy as jnp
from jax.experimental import pallas as pl
from jax.experimental.pallas import tpu as pltpu


# ------------------------------ fused kernel --------------------------------

def _mlp_fused_kernel(x_ref, xt_ref, xb_ref, w1_ref, b1_ref, wdw_ref, bdw_ref,
                      w2_ref, b2_ref, o_ref, xs_ref, hid_ref, *,
                      W, apply_relu, approx_gelu):
    """One (batch, row-group) tile of the fused MLP.

    x_ref   : (1, bh, Wp, Cin)   row-group of the (width-padded) NHWC input
    xt_ref  : (1, 1,  Wp, Cin)   image row just above the group (clamped)
    xb_ref  : (1, 1,  Wp, Cin)   image row just below the group (clamped)
    w1_ref  : (Cin,  Chid)       b1_ref : (1, Chid)
    wdw_ref : (3, 3, Chid)       bdw_ref: (1, Chid)    depthwise 3x3 weights
    w2_ref  : (Chid, Cout)       b2_ref : (1, Cout)
    o_ref   : (1, bh, Wp, Cout)
    xs_ref  : ((bh+2)*Wp, Cin)   VMEM staging: [top halo ; rows ; bottom halo]
    hid_ref : ((bh+2)*Wp, Chid)  f32 VMEM: fc1 activations (never hit HBM)
    """
    _, bh, Wp, Cin = x_ref.shape
    Chid = w1_ref.shape[1]
    M = bh * Wp
    R = (bh + 2) * Wp

    i = pl.program_id(1)
    last = pl.num_programs(1) - 1

    # ---- stage [top halo ; main rows ; bottom halo], then ONE fc1 matmul ----
    xs_ref[0:Wp, :] = xt_ref[0, 0]
    xs_ref[Wp:Wp + M, :] = x_ref[0].reshape(M, Cin)
    xs_ref[Wp + M:R, :] = xb_ref[0, 0]

    hid = jnp.dot(xs_ref[...], w1_ref[...], preferred_element_type=jnp.float32)
    hid = hid + b1_ref[...].astype(jnp.float32)
    if apply_relu:                       # Mlp(linear=True) branch; off by default
        hid = jnp.maximum(hid, 0.0)
    if Wp != W:
        # Zero fc1 output at padded image columns so the depthwise conv sees
        # zero padding at the right edge and across flattened row boundaries.
        col = jax.lax.broadcasted_iota(jnp.int32, (bh + 2, Wp, 1), 1)
        valid = (col < W).astype(jnp.float32).reshape(R, 1)
        hid = hid * valid
    hid_ref[...] = hid

    # Conv zero padding at the image top / bottom edges.
    @pl.when(i == 0)
    def _():
        hid_ref[0:Wp, :] = jnp.zeros((Wp, Chid), jnp.float32)

    @pl.when(i == last)
    def _():
        hid_ref[(bh + 1) * Wp:R, :] = jnp.zeros((Wp, Chid), jnp.float32)

    # ---- 3x3 depthwise conv (cross-correlation, matches torch Conv2d) ------
    # TODO(synk): on v6e/v7x this elementwise block could run in bf16 (and the
    # hid scratch stored bf16) for ~2x VPU throughput; kept f32 for v5e safety.
    wdw = wdw_ref[...].astype(jnp.float32)          # (3, 3, Chid)
    if Wp == W:
        # No padded columns available -> mask the roll wrap-around at W edges.
        col = jax.lax.broadcasted_iota(jnp.int32, (bh, Wp, 1), 1)
        lmask = (col >= 1).astype(jnp.float32).reshape(M, 1)      # (M, 1)
        rmask = (col <= W - 2).astype(jnp.float32).reshape(M, 1)  # (M, 1)

    acc = jnp.zeros((M, Chid), jnp.float32)
    for dh in range(3):
        rows = hid_ref[dh * Wp:dh * Wp + M, :]      # aligned static slice
        left = pltpu.roll(rows, shift=1, axis=0)
        right = pltpu.roll(rows, shift=M - 1, axis=0)
        if Wp == W:
            left = left * lmask
            right = right * rmask
        acc = acc + left * wdw[dh, 0] + rows * wdw[dh, 1] + right * wdw[dh, 2]
    acc = acc + bdw_ref[...].astype(jnp.float32)

    # ---- GELU ----------------------------------------------------------------
    if approx_gelu:
        # tanh formulation (EUP slot; this kernel is VALU-bound for small C);
        # within ~3e-4 abs of exact erf GELU.
        c = 0.7978845608028654                      # sqrt(2/pi)
        g = 0.5 * acc * (1.0 + jnp.tanh(c * (acc + 0.044715 * acc * acc * acc)))
    else:
        g = 0.5 * acc * (1.0 + jax.lax.erf(acc * 0.7071067811865476))

    # ---- fc2 epilogue (dropout p=0.0 -> identity) -----------------------------
    y = jnp.dot(g.astype(w2_ref.dtype), w2_ref[...],
                preferred_element_type=jnp.float32)
    y = y + b2_ref[...].astype(jnp.float32)
    o_ref[0] = y.reshape(bh, Wp, -1).astype(o_ref.dtype)


# ------------------------------ host wrapper --------------------------------

def _round_up(x, m):
    return -(-x // m) * m


def _pick_bh(H, Wp, target_rows, max_rows):
    """Smallest divisor of H reaching target matmul rows (bh*Wp), capped."""
    best = 1
    for d in range(1, H + 1):
        if H % d == 0 and d * Wp <= max_rows:
            best = d
            if d * Wp >= target_rows:
                break
    return best


def _vmem_limit_bytes():
    # Generation-dependent: ~3/4 of physical VMEM (~96 MiB on v5e/v6e,
    # ~48 MiB on v7x).  Fall back to 64 MiB if the query is unavailable.
    try:
        return int(pltpu.get_tpu_info().vmem_capacity_bytes * 3 // 4)
    except Exception:
        return 64 * 1024 * 1024


def mlp_forward(x, params, H, W, *, linear_flag=False, target_rows=512,
                max_rows=4096, mxu_dtype=jnp.bfloat16, approx_gelu=True):
    """Fused Mlp forward: fc1 -> depthwise 3x3 -> GELU -> fc2.

    x: (B, N, Cin) with N == H*W.  Returns (B, N, Cout).
    Default is the perf configuration (bf16 MXU operands, f32 accumulation,
    tanh-approx GELU).  Pass mxu_dtype=None, approx_gelu=False for exact f32
    math matching the PyTorch module bit-for-bit semantics.
    """
    B, N, Cin = x.shape
    assert N == H * W, "sequence length must equal H * W"
    Chid = params["w1"].shape[1]
    Cout = params["w2"].shape[1]
    out_dtype = x.dtype

    # Alignment / lane-density padding (sliced off again below).
    Wp = _round_up(W, 8)
    Chid_p = _round_up(Chid, 128)
    Cout_p = _round_up(Cout, 128)

    x_img = x.reshape(B, H, W, Cin)
    if Wp != W:
        x_img = jnp.pad(x_img, ((0, 0), (0, 0), (0, Wp - W), (0, 0)))

    w1, b1 = params["w1"], params["b1"]
    wdw, bdw = params["wdw"], params["bdw"]
    w2, b2 = params["w2"], params["b2"]
    if Chid_p != Chid:
        dc = Chid_p - Chid
        w1 = jnp.pad(w1, ((0, 0), (0, dc)))
        b1 = jnp.pad(b1, ((0, 0), (0, dc)))
        wdw = jnp.pad(wdw, ((0, 0), (0, 0), (0, dc)))
        bdw = jnp.pad(bdw, ((0, 0), (0, dc)))
        w2 = jnp.pad(w2, ((0, dc), (0, 0)))
    if Cout_p != Cout:
        w2 = jnp.pad(w2, ((0, 0), (0, Cout_p - Cout)))
        b2 = jnp.pad(b2, ((0, 0), (0, Cout_p - Cout)))
    if mxu_dtype is not None:
        x_img = x_img.astype(mxu_dtype)
        w1 = w1.astype(mxu_dtype)
        w2 = w2.astype(mxu_dtype)

    bh = _pick_bh(H, Wp, target_rows, max_rows)     # image rows per grid step
    n_rt = H // bh

    kernel = functools.partial(_mlp_fused_kernel, W=W,
                               apply_relu=linear_flag, approx_gelu=approx_gelu)

    flops = (2 * B * H * Wp * (Cin * Chid_p + Chid_p * Cout_p)
             + 18 * B * H * Wp * Chid_p)
    bytes_accessed = (x_img.size * x_img.dtype.itemsize
                      + B * H * Wp * Cout_p * jnp.dtype(out_dtype).itemsize
                      + w1.size * w1.dtype.itemsize
                      + w2.size * w2.dtype.itemsize
                      + 4 * (wdw.size + b1.size + bdw.size + b2.size))

    out = pl.pallas_call(
        kernel,
        out_shape=jax.ShapeDtypeStruct((B, H, Wp, Cout_p), out_dtype),
        grid=(B, n_rt),
        in_specs=[
            # main row-group (auto double-buffered by the pipeline)
            pl.BlockSpec((1, bh, Wp, Cin), lambda b, i: (b, i, 0, 0)),
            # 1-row halos above / below the group, clamped at the image edges
            pl.BlockSpec((1, 1, Wp, Cin),
                         lambda b, i: (b, jnp.maximum(i * bh - 1, 0), 0, 0)),
            pl.BlockSpec((1, 1, Wp, Cin),
                         lambda b, i: (b, jnp.minimum(i * bh + bh, H - 1), 0, 0)),
            # weights / biases: constant block index -> fetched once, resident.
            # TODO(synk): pipeline_mode=pl.Buffered(1) here (v7x VMEM saving)
            # once single-buffered constant blocks are confirmed supported.
            pl.BlockSpec((Cin, Chid_p), lambda b, i: (0, 0)),
            pl.BlockSpec((1, Chid_p), lambda b, i: (0, 0)),
            pl.BlockSpec((3, 3, Chid_p), lambda b, i: (0, 0, 0)),
            pl.BlockSpec((1, Chid_p), lambda b, i: (0, 0)),
            pl.BlockSpec((Chid_p, Cout_p), lambda b, i: (0, 0)),
            pl.BlockSpec((1, Cout_p), lambda b, i: (0, 0)),
        ],
        # Cout_p is a multiple of 128 -> lane-dense (unmasked) output stores.
        out_specs=pl.BlockSpec((1, bh, Wp, Cout_p), lambda b, i: (b, i, 0, 0)),
        scratch_shapes=[
            pltpu.VMEM(((bh + 2) * Wp, Cin), x_img.dtype),      # x staging
            pltpu.VMEM(((bh + 2) * Wp, Chid_p), jnp.float32),   # fc1 hidden
        ],
        # TODO(synk): for very large Chid, add a hidden-channel grid axis with
        # an f32 output accumulator (K-accumulated fc2) to bound VMEM on v7x.
        compiler_params=pltpu.CompilerParams(
            dimension_semantics=("parallel", "parallel"),
            vmem_limit_bytes=_vmem_limit_bytes()),
        cost_estimate=pl.CostEstimate(
            flops=int(flops),
            transcendentals=int(B * H * Wp * Chid_p),
            bytes_accessed=int(bytes_accessed)),
    )(x_img, x_img, x_img, w1, b1, wdw, bdw, w2, b2)

    return out[:, :, :W, :Cout].reshape(B, N, Cout)


# ------------------------- deterministic parameters -------------------------

def init_params(key, in_features, hidden_features, out_features):
    k1, k2, k3 = jax.random.split(key, 3)
    # nn.Linear: trunc_normal std=0.02, bias=0 (stored transposed: (in, out))
    w1 = (jax.random.truncated_normal(k1, -2.0, 2.0,
                                      (in_features, hidden_features),
                                      jnp.float32) * 0.02)
    b1 = jnp.zeros((1, hidden_features), jnp.float32)
    # depthwise Conv2d(dim, dim, 3, groups=dim): normal(0, sqrt(2/fan_out)), fan_out=9
    fan_out = 3 * 3 * hidden_features // hidden_features
    wdw = (jax.random.normal(k2, (3, 3, hidden_features), jnp.float32)
           * math.sqrt(2.0 / fan_out))
    bdw = jnp.zeros((1, hidden_features), jnp.float32)
    w2 = (jax.random.truncated_normal(k3, -2.0, 2.0,
                                      (hidden_features, out_features),
                                      jnp.float32) * 0.02)
    b2 = jnp.zeros((1, out_features), jnp.float32)
    return dict(w1=w1, b1=b1, wdw=wdw, bdw=bdw, w2=w2, b2=b2)


# --------------------------------- reference ---------------------------------

def mlp_reference(x, params, H, W):
    B, N, Cin = x.shape
    Chid = params["w1"].shape[1]
    hp = jax.lax.Precision.HIGHEST
    h = jnp.dot(x.reshape(B * N, Cin), params["w1"], precision=hp) + params["b1"]
    h = h.reshape(B, H, W, Chid)
    k = params["wdw"][:, :, None, :]             # HWIO, depthwise
    h = jax.lax.conv_general_dilated(
        h, k, window_strides=(1, 1), padding="SAME",
        dimension_numbers=("NHWC", "HWIO", "NHWC"),
        feature_group_count=Chid, precision=hp)
    h = h + params["bdw"].reshape(1, 1, 1, Chid)
    h = 0.5 * h * (1.0 + jax.lax.erf(h / jnp.sqrt(2.0)))
    h = jnp.dot(h.reshape(B * N, Chid), params["w2"], precision=hp) + params["b2"]
    return h.reshape(B, N, -1)


# ----------------------------------- main ------------------------------------

if __name__ == "__main__":
    # Typical ViT feature-map sizes; W=14 exercises the width-padding path and
    # Cout=64 exercises the lane-dense output padding (64 -> 128 -> sliced).
    B, H, W = 2, 14, 14
    N = H * W
    in_features, hidden_features = 64, 128
    out_features = in_features

    key = jax.random.PRNGKey(0)
    kx, kp = jax.random.split(key)
    x = jax.random.normal(kx, (B, N, in_features), jnp.float32)
    params = init_params(kp, in_features, hidden_features, out_features)

    ref = mlp_reference(x, params, H, W)

    # 1) exact-math path (f32 MXU operands, erf GELU): tight check vs reference
    out_f32 = jax.block_until_ready(
        mlp_forward(x, params, H, W, mxu_dtype=None, approx_gelu=False))
    assert out_f32.shape == (B, N, out_features)
    assert jnp.allclose(out_f32, ref, atol=2e-3, rtol=2e-3), \
        "f32 path mismatch vs JAX reference"

    # 2) default perf path (bf16 MXU operands + tanh GELU): looser tolerance,
    #    as documented — bf16 operands and the tanh approximation shift results
    #    by O(1e-3) relative.
    out_bf16 = jax.block_until_ready(mlp_forward(x, params, H, W))
    assert out_bf16.shape == (B, N, out_features)
    assert jnp.allclose(out_bf16, ref, atol=3e-2, rtol=3e-2), \
        "bf16 path mismatch vs JAX reference"

    print("KERNEL_OK")
</pallas_src>

<mosaic_0001>
module attributes {stable_mosaic.version = 11 : i64} {
  func.func @_mlp_fused_kernel(%arg0: i32, %arg1: i32, %arg2: memref<1x14x16x64xf32, #tpu.memory_space<vmem>>, %arg3: memref<1x1x16x64xf32, #tpu.memory_space<vmem>>, %arg4: memref<1x1x16x64xf32, #tpu.memory_space<vmem>>, %arg5: memref<64x128xf32, #tpu.memory_space<vmem>>, %arg6: memref<1x128xf32, #tpu.memory_space<vmem>>, %arg7: memref<3x3x128xf32, #tpu.memory_space<vmem>>, %arg8: memref<1x128xf32, #tpu.memory_space<vmem>>, %arg9: memref<128x128xf32, #tpu.memory_space<vmem>>, %arg10: memref<1x128xf32, #tpu.memory_space<vmem>>, %arg11: memref<1x14x16x128xf32, #tpu.memory_space<vmem>>, %arg12: memref<256x64xf32, #tpu.memory_space<vmem>>, %arg13: memref<256x128xf32, #tpu.memory_space<vmem>>) attributes {dimension_semantics = [#tpu.dimension_semantics<parallel>, #tpu.dimension_semantics<parallel>], iteration_bounds = array<i64: 2, 1>, scalar_prefetch = 0 : i64, scratch_operands = 2 : i64, tpu.core_type = #tpu.core_type<tc>, window_params = [{transform_indices = @transform_0, window_bounds = array<i64: 1, 14, 16, 64>}, {transform_indices = @transform_1, window_bounds = array<i64: 1, 1, 16, 64>}, {transform_indices = @transform_2, window_bounds = array<i64: 1, 1, 16, 64>}, {pipeline_mode = #tpu.pipeline_mode<synchronous>, transform_indices = @transform_3, window_bounds = array<i64: 64, 128>}, {pipeline_mode = #tpu.pipeline_mode<synchronous>, transform_indices = @transform_4, window_bounds = array<i64: 1, 128>}, {pipeline_mode = #tpu.pipeline_mode<synchronous>, transform_indices = @transform_5, window_bounds = array<i64: 3, 3, 128>}, {pipeline_mode = #tpu.pipeline_mode<synchronous>, transform_indices = @transform_6, window_bounds = array<i64: 1, 128>}, {pipeline_mode = #tpu.pipeline_mode<synchronous>, transform_indices = @transform_7, window_bounds = array<i64: 128, 128>}, {pipeline_mode = #tpu.pipeline_mode<synchronous>, transform_indices = @transform_8, window_bounds = array<i64: 1, 128>}, {transform_indices = @transform_9, window_bounds = array<i64: 1, 14, 16, 128>}]} {
    %c0 = arith.constant 0 : index
    %c0_0 = arith.constant 0 : index
    %c0_1 = arith.constant 0 : index
    %c0_2 = arith.constant 0 : index
    %0 = vector.load %arg3[%c0, %c0_0, %c0_1, %c0_2] : memref<1x1x16x64xf32, #tpu.memory_space<vmem>>, vector<1x1x16x64xf32>
    %1 = vector.shape_cast %0 : vector<1x1x16x64xf32> to vector<16x64xf32>
    %c0_3 = arith.constant 0 : index
    %c0_4 = arith.constant 0 : index
    %2 = vector.load %arg12[%c0_3, %c0_4] : memref<256x64xf32, #tpu.memory_space<vmem>>, vector<16x64xf32>
    tpu.vector_store %arg12[%c0_3, %c0_4], %1 {strides = array<i32>} : memref<256x64xf32, #tpu.memory_space<vmem>>, vector<16x64xf32>,
    %c0_5 = arith.constant 0 : index
    %c0_6 = arith.constant 0 : index
    %c0_7 = arith.constant 0 : index
    %c0_8 = arith.constant 0 : index
    %3 = vector.load %arg2[%c0_5, %c0_6, %c0_7, %c0_8] : memref<1x14x16x64xf32, #tpu.memory_space<vmem>>, vector<1x14x16x64xf32>
    %4 = vector.shape_cast %3 : vector<1x14x16x64xf32> to vector<14x16x64xf32>
    %5 = vector.shape_cast %4 : vector<14x16x64xf32> to vector<224x64xf32>
    %c16 = arith.constant 16 : index
    %c0_9 = arith.constant 0 : index
    %6 = vector.load %arg12[%c16, %c0_9] : memref<256x64xf32, #tpu.memory_space<vmem>>, vector<224x64xf32>
    tpu.vector_store %arg12[%c16, %c0_9], %5 {strides = array<i32>} : memref<256x64xf32, #tpu.memory_space<vmem>>, vector<224x64xf32>,
    %c0_10 = arith.constant 0 : index
    %c0_11 = arith.constant 0 : index
    %c0_12 = arith.constant 0 : index
    %c0_13 = arith.constant 0 : index
    %7 = vector.load %arg4[%c0_10, %c0_11, %c0_12, %c0_13] : memref<1x1x16x64xf32, #tpu.memory_space<vmem>>, vector<1x1x16x64xf32>
    %8 = vector.shape_cast %7 : vector<1x1x16x64xf32> to vector<16x64xf32>
    %c240 = arith.constant 240 : index
    %c0_14 = arith.constant 0 : index
    %9 = vector.load %arg12[%c240, %c0_14] : memref<256x64xf32, #tpu.memory_space<vmem>>, vector<16x64xf32>
    tpu.vector_store %arg12[%c240, %c0_14], %8 {strides = array<i32>} : memref<256x64xf32, #tpu.memory_space<vmem>>, vector<16x64xf32>,
    %c0_15 = arith.constant 0 : index
    %c0_16 = arith.constant 0 : index
    %10 = vector.load %arg12[%c0_15, %c0_16] : memref<256x64xf32, #tpu.memory_space<vmem>>, vector<256x64xf32>
    %c0_17 = arith.constant 0 : index
    %c0_18 = arith.constant 0 : index
    %11 = vector.load %arg5[%c0_17, %c0_18] : memref<64x128xf32, #tpu.memory_space<vmem>>, vector<64x128xf32>
    %cst = arith.constant dense<0.000000e+00> : vector<256x128xf32>
    %12 = tpu.matmul %10, %11, %cst {dimension_numbers = #tpu.dot_dimension_numbers<[1], [0], [0], [1], [0, 0, 1, 1], [], []>} : vector<256x64xf32>, vector<64x128xf32>, vector<256x128xf32> -> vector<256x128xf32>
    %c0_19 = arith.constant 0 : index
    %c0_20 = arith.constant 0 : index
    %13 = vector.load %arg6[%c0_19, %c0_20] : memref<1x128xf32, #tpu.memory_space<vmem>>, vector<1x128xf32>
    %14 = vector.broadcast %13 : vector<1x128xf32> to vector<256x128xf32>
    %15 = arith.addf %12, %14 : vector<256x128xf32>
    %16 = tpu.iota {dimensions = array<i32: 1>} : vector<16x16x1xi32>
    %c14_i32 = arith.constant 14 : i32
    %17 = vector.broadcast %c14_i32 : i32 to vector<16x16x1xi32>
    %18 = arith.cmpi slt, %16, %17 : vector<16x16x1xi32>
    %19 = arith.extui %18 : vector<16x16x1xi1> to vector<16x16x1xi32>
    %20 = arith.sitofp %19 : vector<16x16x1xi32> to vector<16x16x1xf32>
    %21 = vector.shape_cast %20 : vector<16x16x1xf32> to vector<256x1xf32>
    %22 = vector.broadcast %21 : vector<256x1xf32> to vector<256x128xf32>
    %23 = arith.mulf %15, %22 : vector<256x128xf32>
    %c0_21 = arith.constant 0 : index
    %c0_22 = arith.constant 0 : index
    %24 = vector.load %arg13[%c0_21, %c0_22] : memref<256x128xf32, #tpu.memory_space<vmem>>, vector<256x128xf32>
    tpu.vector_store %arg13[%c0_21, %c0_22], %23 {strides = array<i32>} : memref<256x128xf32, #tpu.memory_space<vmem>>, vector<256x128xf32>,
    %c0_i32 = arith.constant 0 : i32
    %25 = arith.cmpi eq, %arg1, %c0_i32 : i32
    %26 = arith.extui %25 : i1 to i32
    %c0_i32_23 = arith.constant 0 : i32
    %27 = arith.cmpi ne, %26, %c0_i32_23 : i32
    scf.if %27 {
      %cst_53 = arith.constant 0.000000e+00 : f32
      %116 = vector.broadcast %cst_53 : f32 to vector<16x128xf32>
      %c0_54 = arith.constant 0 : index
      %c0_55 = arith.constant 0 : index
      %117 = vector.load %arg13[%c0_54, %c0_55] : memref<256x128xf32, #tpu.memory_space<vmem>>, vector<16x128xf32>
      tpu.vector_store %arg13[%c0_54, %c0_55], %116 {strides = array<i32>} : memref<256x128xf32, #tpu.memory_space<vmem>>, vector<16x128xf32>,
    } else {
    }
    %c0_i32_24 = arith.constant 0 : i32
    %28 = arith.cmpi eq, %arg1, %c0_i32_24 : i32
    %29 = arith.extui %28 : i1 to i32
    %c0_i32_25 = arith.constant 0 : i32
    %30 = arith.cmpi ne, %29, %c0_i32_25 : i32
    scf.if %30 {
      %cst_53 = arith.constant 0.000000e+00 : f32
      %116 = vector.broadcast %cst_53 : f32 to vector<16x128xf32>
      %c240_54 = arith.constant 240 : index
      %c0_55 = arith.constant 0 : index
      %117 = vector.load %arg13[%c240_54, %c0_55] : memref<256x128xf32, #tpu.memory_space<vmem>>, vector<16x128xf32>
      tpu.vector_store %arg13[%c240_54, %c0_55], %116 {strides = array<i32>} : memref<256x128xf32, #tpu.memory_space<vmem>>, vector<16x128xf32>,
    } else {
    }
    %c0_26 = arith.constant 0 : index
    %c0_27 = arith.constant 0 : index
    %c0_28 = arith.constant 0 : index
    %31 = vector.load %arg7[%c0_26, %c0_27, %c0_28] : memref<3x3x128xf32, #tpu.memory_space<vmem>>, vector<3x3x128xf32>
    %cst_29 = arith.constant 0.000000e+00 : f32
    %32 = vector.broadcast %cst_29 : f32 to vector<224x128xf32>
    %c0_30 = arith.constant 0 : index
    %c0_31 = arith.constant 0 : index
    %33 = vector.load %arg13[%c0_30, %c0_31] : memref<256x128xf32, #tpu.memory_space<vmem>>, vector<224x128xf32>
    %c1_i32 = arith.constant 1 : i32
    %34 = tpu.dynamic_rotate %33 by %c1_i32 dim 0 : vector<224x128xf32>, i32 -> vector<224x128xf32>
    %c223_i32 = arith.constant 223 : i32
    %35 = tpu.dynamic_rotate %33 by %c223_i32 dim 0 : vector<224x128xf32>, i32 -> vector<224x128xf32>
    %36 = vector.extract_strided_slice %31 {offsets = [0, 0, 0], sizes = [1, 1, 128], strides = [1, 1, 1]} : vector<3x3x128xf32> to vector<1x1x128xf32>
    %37 = vector.shape_cast %36 : vector<1x1x128xf32> to vector<128xf32>
    %38 = vector.shape_cast %37 : vector<128xf32> to vector<1x128xf32>
    %39 = vector.broadcast %38 : vector<1x128xf32> to vector<224x128xf32>
    %40 = arith.mulf %34, %39 : vector<224x128xf32>
    %41 = arith.addf %32, %40 : vector<224x128xf32>
    %42 = vector.extract_strided_slice %31 {offsets = [0, 1, 0], sizes = [1, 1, 128], strides = [1, 1, 1]} : vector<3x3x128xf32> to vector<1x1x128xf32>
    %43 = vector.shape_cast %42 : vector<1x1x128xf32> to vector<128xf32>
    %44 = vector.shape_cast %43 : vector<128xf32> to vector<1x128xf32>
    %45 = vector.broadcast %44 : vector<1x128xf32> to vector<224x128xf32>
    %46 = arith.mulf %33, %45 : vector<224x128xf32>
    %47 = arith.addf %41, %46 : vector<224x128xf32>
    %48 = vector.extract_strided_slice %31 {offsets = [0, 2, 0], sizes = [1, 1, 128], strides = [1, 1, 1]} : vector<3x3x128xf32> to vector<1x1x128xf32>
    %49 = vector.shape_cast %48 : vector<1x1x128xf32> to vector<128xf32>
    %50 = vector.shape_cast %49 : vector<128xf32> to vector<1x128xf32>
    %51 = vector.broadcast %50 : vector<1x128xf32> to vector<224x128xf32>
    %52 = arith.mulf %35, %51 : vector<224x128xf32>
    %53 = arith.addf %47, %52 : vector<224x128xf32>
    %c16_32 = arith.constant 16 : index
    %c0_33 = arith.constant 0 : index
    %54 = vector.load %arg13[%c16_32, %c0_33] : memref<256x128xf32, #tpu.memory_space<vmem>>, vector<224x128xf32>
    %c1_i32_34 = arith.constant 1 : i32
    %55 = tpu.dynamic_rotate %54 by %c1_i32_34 dim 0 : vector<224x128xf32>, i32 -> vector<224x128xf32>
    %c223_i32_35 = arith.constant 223 : i32
    %56 = tpu.dynamic_rotate %54 by %c223_i32_35 dim 0 : vector<224x128xf32>, i32 -> vector<224x128xf32>
    %57 = vector.extract_strided_slice %31 {offsets = [1, 0, 0], sizes = [1, 1, 128], strides = [1, 1, 1]} : vector<3x3x128xf32> to vector<1x1x128xf32>
    %58 = vector.shape_cast %57 : vector<1x1x128xf32> to vector<128xf32>
    %59 = vector.shape_cast %58 : vector<128xf32> to vector<1x128xf32>
    %60 = vector.broadcast %59 : vector<1x128xf32> to vector<224x128xf32>
    %61 = arith.mulf %55, %60 : vector<224x128xf32>
    %62 = arith.addf %53, %61 : vector<224x128xf32>
    %63 = vector.extract_strided_slice %31 {offsets = [1, 1, 0], sizes = [1, 1, 128], strides = [1, 1, 1]} : vector<3x3x128xf32> to vector<1x1x128xf32>
    %64 = vector.shape_cast %63 : vector<1x1x128xf32> to vector<128xf32>
    %65 = vector.shape_cast %64 : vector<128xf32> to vector<1x128xf32>
    %66 = vector.broadcast %65 : vector<1x128xf32> to vector<224x128xf32>
    %67 = arith.mulf %54, %66 : vector<224x128xf32>
    %68 = arith.addf %62, %67 : vector<224x128xf32>
    %69 = vector.extract_strided_slice %31 {offsets = [1, 2, 0], sizes = [1, 1, 128], strides = [1, 1, 1]} : vector<3x3x128xf32> to vector<1x1x128xf32>
    %70 = vector.shape_cast %69 : vector<1x1x128xf32> to vector<128xf32>
    %71 = vector.shape_cast %70 : vector<128xf32> to vector<1x128xf32>
    %72 = vector.broadcast %71 : vector<1x128xf32> to vector<224x128xf32>
    %73 = arith.mulf %56, %72 : vector<224x128xf32>
    %74 = arith.addf %68, %73 : vector<224x128xf32>
    %c32 = arith.constant 32 : index
    %c0_36 = arith.constant 0 : index
    %75 = vector.load %arg13[%c32, %c0_36] : memref<256x128xf32, #tpu.memory_space<vmem>>, vector<224x128xf32>
    %c1_i32_37 = arith.constant 1 : i32
    %76 = tpu.dynamic_rotate %75 by %c1_i32_37 dim 0 : vector<224x128xf32>, i32 -> vector<224x128xf32>
    %c223_i32_38 = arith.constant 223 : i32
    %77 = tpu.dynamic_rotate %75 by %c223_i32_38 dim 0 : vector<224x128xf32>, i32 -> vector<224x128xf32>
    %78 = vector.extract_strided_slice %31 {offsets = [2, 0, 0], sizes = [1, 1, 128], strides = [1, 1, 1]} : vector<3x3x128xf32> to vector<1x1x128xf32>
    %79 = vector.shape_cast %78 : vector<1x1x128xf32> to vector<128xf32>
    %80 = vector.shape_cast %79 : vector<128xf32> to vector<1x128xf32>
    %81 = vector.broadcast %80 : vector<1x128xf32> to vector<224x128xf32>
    %82 = arith.mulf %76, %81 : vector<224x128xf32>
    %83 = arith.addf %74, %82 : vector<224x128xf32>
    %84 = vector.extract_strided_slice %31 {offsets = [2, 1, 0], sizes = [1, 1, 128], strides = [1, 1, 1]} : vector<3x3x128xf32> to vector<1x1x128xf32>
    %85 = vector.shape_cast %84 : vector<1x1x128xf32> to vector<128xf32>
    %86 = vector.shape_cast %85 : vector<128xf32> to vector<1x128xf32>
    %87 = vector.broadcast %86 : vector<1x128xf32> to vector<224x128xf32>
    %88 = arith.mulf %75, %87 : vector<224x128xf32>
    %89 = arith.addf %83, %88 : vector<224x128xf32>
    %90 = vector.extract_strided_slice %31 {offsets = [2, 2, 0], sizes = [1, 1, 128], strides = [1, 1, 1]} : vector<3x3x128xf32> to vector<1x1x128xf32>
    %91 = vector.shape_cast %90 : vector<1x1x128xf32> to vector<128xf32>
    %92 = vector.shape_cast %91 : vector<128xf32> to vector<1x128xf32>
    %93 = vector.broadcast %92 : vector<1x128xf32> to vector<224x128xf32>
    %94 = arith.mulf %77, %93 : vector<224x128xf32>
    %95 = arith.addf %89, %94 : vector<224x128xf32>
    %c0_39 = arith.constant 0 : index
    %c0_40 = arith.constant 0 : index
    %96 = vector.load %arg8[%c0_39, %c0_40] : memref<1x128xf32, #tpu.memory_space<vmem>>, vector<1x128xf32>
    %97 = vector.broadcast %96 : vector<1x128xf32> to vector<224x128xf32>
    %98 = arith.addf %95, %97 : vector<224x128xf32>
    %cst_41 = arith.constant 5.000000e-01 : f32
    %99 = vector.broadcast %cst_41 : f32 to vector<224x128xf32>
    %100 = arith.mulf %99, %98 : vector<224x128xf32>
    %cst_42 = arith.constant 0.707106769 : f32
    %101 = vector.broadcast %cst_42 : f32 to vector<224x128xf32>
    %102 = arith.mulf %98, %101 : vector<224x128xf32>
    %103 = math.erf %102 : vector<224x128xf32>
    %cst_43 = arith.constant 1.000000e+00 : f32
    %104 = vector.broadcast %cst_43 : f32 to vector<224x128xf32>
    %105 = arith.addf %104, %103 : vector<224x128xf32>
    %106 = arith.mulf %100, %105 : vector<224x128xf32>
    %c0_44 = arith.constant 0 : index
    %c0_45 = arith.constant 0 : index
    %107 = vector.load %arg9[%c0_44, %c0_45] : memref<128x128xf32, #tpu.memory_space<vmem>>, vector<128x128xf32>
    %cst_46 = arith.constant dense<0.000000e+00> : vector<224x128xf32>
    %108 = tpu.matmul %106, %107, %cst_46 {dimension_numbers = #tpu.dot_dimension_numbers<[1], [0], [0], [1], [0, 0, 1, 1], [], []>} : vector<224x128xf32>, vector<128x128xf32>, vector<224x128xf32> -> vector<224x128xf32>
    %c0_47 = arith.constant 0 : index
    %c0_48 = arith.constant 0 : index
    %109 = vector.load %arg10[%c0_47, %c0_48] : memref<1x128xf32, #tpu.memory_space<vmem>>, vector<1x128xf32>
    %110 = vector.broadcast %109 : vector<1x128xf32> to vector<224x128xf32>
    %111 = arith.addf %108, %110 : vector<224x128xf32>
    %112 = vector.shape_cast %111 : vector<224x128xf32> to vector<14x16x128xf32>
    %c0_49 = arith.constant 0 : index
    %c0_50 = arith.constant 0 : index
    %c0_51 = arith.constant 0 : index
    %c0_52 = arith.constant 0 : index
    %113 = vector.load %arg11[%c0_49, %c0_50, %c0_51, %c0_52] : memref<1x14x16x128xf32, #tpu.memory_space<vmem>>, vector<1x14x16x128xf32>
    %114 = vector.shape_cast %113 : vector<1x14x16x128xf32> to vector<14x16x128xf32>
    %115 = vector.shape_cast %112 : vector<14x16x128xf32> to vector<1x14x16x128xf32>
    tpu.vector_store %arg11[%c0_49, %c0_50, %c0_51, %c0_52], %115 {strides = array<i32>} : memref<1x14x16x128xf32, #tpu.memory_space<vmem>>, vector<1x14x16x128xf32>,
    return
  }
  func.func @transform_0(%arg0: i32, %arg1: i32) -> (i32, i32, i32, i32) {
    %c0_i32 = arith.constant 0 : i32
    %c0_i32_0 = arith.constant 0 : i32
    %c0_i32_1 = arith.constant 0 : i32
    return %arg0, %arg1, %c0_i32, %c0_i32_0 : i32, i32, i32, i32
  }
  func.func @transform_1(%arg0: i32, %arg1: i32) -> (i32, i32, i32, i32) {
    %c14_i32 = arith.constant 14 : i32
    %0 = arith.muli %arg1, %c14_i32 : i32
    %c1_i32 = arith.constant 1 : i32
    %1 = arith.subi %0, %c1_i32 : i32
    %c0_i32 = arith.constant 0 : i32
    %2 = arith.maxsi %1, %c0_i32 : i32
    %c0_i32_0 = arith.constant 0 : i32
    %c0_i32_1 = arith.constant 0 : i32
    %c0_i32_2 = arith.constant 0 : i32
    return %arg0, %2, %c0_i32_0, %c0_i32_1 : i32, i32, i32, i32
  }
  func.func @transform_2(%arg0: i32, %arg1: i32) -> (i32, i32, i32, i32) {
    %c14_i32 = arith.constant 14 : i32
    %0 = arith.muli %arg1, %c14_i32 : i32
    %c14_i32_0 = arith.constant 14 : i32
    %1 = arith.addi %0, %c14_i32_0 : i32
    %c13_i32 = arith.constant 13 : i32
    %2 = arith.minsi %1, %c13_i32 : i32
    %c0_i32 = arith.constant 0 : i32
    %c0_i32_1 = arith.constant 0 : i32
    %c0_i32_2 = arith.constant 0 : i32
    return %arg0, %2, %c0_i32, %c0_i32_1 : i32, i32, i32, i32
  }
  func.func @transform_3(%arg0: i32, %arg1: i32) -> (i32, i32) {
    %c0_i32 = arith.constant 0 : i32
    %c0_i32_0 = arith.constant 0 : i32
    %c0_i32_1 = arith.constant 0 : i32
    return %c0_i32, %c0_i32_0 : i32, i32
  }
  func.func @transform_4(%arg0: i32, %arg1: i32) -> (i32, i32) {
    %c0_i32 = arith.constant 0 : i32
    %c0_i32_0 = arith.constant 0 : i32
    %c0_i32_1 = arith.constant 0 : i32
    return %c0_i32, %c0_i32_0 : i32, i32
  }
  func.func @transform_5(%arg0: i32, %arg1: i32) -> (i32, i32, i32) {
    %c0_i32 = arith.constant 0 : i32
    %c0_i32_0 = arith.constant 0 : i32
    %c0_i32_1 = arith.constant 0 : i32
    %c0_i32_2 = arith.constant 0 : i32
    return %c0_i32, %c0_i32_0, %c0_i32_1 : i32, i32, i32
  }
  func.func @transform_6(%arg0: i32, %arg1: i32) -> (i32, i32) {
    %c0_i32 = arith.constant 0 : i32
    %c0_i32_0 = arith.constant 0 : i32
    %c0_i32_1 = arith.constant 0 : i32
    return %c0_i32, %c0_i32_0 : i32, i32
  }
  func.func @transform_7(%arg0: i32, %arg1: i32) -> (i32, i32) {
    %c0_i32 = arith.constant 0 : i32
    %c0_i32_0 = arith.constant 0 : i32
    %c0_i32_1 = arith.constant 0 : i32
    return %c0_i32, %c0_i32_0 : i32, i32
  }
  func.func @transform_8(%arg0: i32, %arg1: i32) -> (i32, i32) {
    %c0_i32 = arith.constant 0 : i32
    %c0_i32_0 = arith.constant 0 : i32
    %c0_i32_1 = arith.constant 0 : i32
    return %c0_i32, %c0_i32_0 : i32, i32
  }
  func.func @transform_9(%arg0: i32, %arg1: i32) -> (i32, i32, i32, i32) {
    %c0_i32 = arith.constant 0 : i32
    %c0_i32_0 = arith.constant 0 : i32
    %c0_i32_1 = arith.constant 0 : i32
    return %arg0, %arg1, %c0_i32, %c0_i32_0 : i32, i32, i32, i32
  }
}

</mosaic_0001>

<bundles_post_ra>
// kernel: tpu_custom_call.1
= control target key start
LH: loop header
LB: loop body
LE: loop exit
PB: predicated region body
PF: predicated region fallthrough
CT: control target
= control target key end

     0   :  { %s5077_s0 = inlined_call_operand.hbm [shape: f32[2,14,16,64], index: 0, kind: input, shape index: {}]   ;;  %s5078_s1 = inlined_call_operand.hbm [shape: f32[2,14,16,64], index: 1, kind: input, shape index: {}]   ;;  %s5079_s2 = inlined_call_operand.hbm [shape: f32[2,14,16,64], index: 2, kind: input, shape index: {}]   ;;  %s5080_s3 = inlined_call_operand.hbm [shape: f32[64,128], index: 3, kind: input, shape index: {}]   ;;  %s5081_s4 = inlined_call_operand.vmem [shape: f32[1,128], index: 4, kind: input, shape index: {}]   ;;  %s5082_s5 = inlined_call_operand.hbm [shape: f32[3,3,128], index: 5, kind: input, shape index: {}]   ;;  %s5083_s6 = inlined_call_operand.vmem [shape: f32[1,128], index: 6, kind: input, shape index: {}]   ;;  %s5084_s7 = inlined_call_operand.hbm [shape: f32[128,128], index: 7, kind: input, shape index: {}]   ;;  %s5085_s8 = inlined_call_operand.vmem [shape: f32[1,128], index: 8, kind: input, shape index: {}]   ;;  %s5086_s9 = inlined_call_operand.hbm [shape: f32[2,14,16,128], index: 9, kind: output, shape index: {}]  }
   0x1   :  { %5157 = sst [smem:[#allocation146_spill]] %s5078_s1 }
   0x2   :  { %5158 = sst [smem:[#allocation147_spill]] %s5080_s3 }
   0x3   :  { %5159 = sst [smem:[#allocation148_spill]] %s5082_s5 }
   0x4   :  { %5160 = sst [smem:[#allocation149_spill]] %s5085_s8 }
   0x5   :  { %5161 = sst [smem:[#allocation150_spill]] %s5086_s9 }
   0x6   :  { %14 = vsyncpa [#allocation5], 0 }
   0x7   :  { %16 = vsyncpa [#allocation5 + $0x1], 0 }
   0x8   :  { %17 = vsyncpa [#allocation8], 0 }
   0x9   :  { %19 = vsyncpa [#allocation8 + $0x1], 0 }
   0xa   :  { %20 = vsyncpa [#allocation11], 0 }
   0xb   :  { %21 = vsyncpa [#allocation14], 0 }
   0xc   :  { %22 = vsyncpa [#allocation6], 0 }
   0xd   :  { %24 = vsyncpa [#allocation6 + $0x1], 0  ;;  %s3304_s30 = smov 0   ;;  %s3306_s10 = smov 0  }
   0xe   :  { %s3308_s11 = smov 0   ;;  %s3310_s12 = smov 0  }
   0xf   :  { %s3312_s13 = smov 0   ;;  %s3314_s14 = smov 0  }
  0x10 LB: > { %5162 = sst [smem:[#allocation21_spill]] %s3218_s30  ;;  %s3335_s15 = sadd.s32 4294967295, %s3238_s14   ;;  %s3238_s14 = sphi %s3314_s14, %s30_s14   ;;  %s3234_s13 = sphi %s3312_s13, %s5478_s13   ;;  %s3230_s12 = sphi %s3310_s12, %s5477_s12   ;;  %s3226_s11 = sphi %s3308_s11, %s5476_s11   ;;  %s3222_s10 = sphi %s3306_s10, %s5480_s10   ;;  %s3218_s30 = sphi %s3304_s30, %s5479_s30  }
  0x11   : > { %5163 = sst [smem:[#allocation22_spill]] %s3226_s11  ;;  %s2498_s16 = sadd.s32 4294967294, %s3238_s14  }
  0x12   : > { %5164 = sst [smem:[#allocation23_spill]] %s3230_s12  ;;  %p58_p0 = scmp.ne.s32.totalorder %s3226_s11, %s3222_s10 }
  0x13   : > { %5165 = sst [smem:[#allocation24_spill]] %s3234_s13  ;;  %p59_p1 = scmp.eq.s32.totalorder %s3238_s14, 0 }
  0x14   : > { %p64_p2 = scmp.ne.s32.totalorder %s3222_s10, %s3218_s30  ;;  %p5087_p3 = scmp.eq.s32.totalorder %s3335_s15, 0 }
  0x15   : > { %p288_p4 = scmp.eq.s32.totalorder %s3335_s15, 1  ;;  %p3346_p5 = por %p59_p1, %p58_p0 }
  0x16   : > { %p294_p6 = scmp.eq.s32.totalorder %s2498_s16, 1  ;;  %p3352_p7 = por %p5087_p3, %p64_p2 }
  0x17   : > { %p3356_p8 = por %p288_p4, %p58_p0  ;;  %p2499_p10 = scmp.ge.s32.totalorder %s3238_s14, 1 }
  0x18   : > { %p3360_p9 = por %p294_p6, %p64_p2  ;;  %p301_p11 = scmp.lt.s32.totalorder %s3238_s14, 3 }
  0x19   : > { %s5168_s20 = scalar_select %p3356_p8, 1, 0 }
  0x1a   : > { %s5170_s21 = scalar_select %p3360_p9, 1, 0 }
  0x1b   : > { %5169 = sst [smem:[#allocation25_spill]] %s5168_s20  ;;  %p3366_p12 = pnand %p2499_p10, %p301_p11 }
  0x1c   : > { %5171 = sst [smem:[#allocation26_spill]] %s5170_s21  ;;  %s3240_s23 = smov [#allocation10]  }
  0x1d   : > { %s313_s24 = sshll.u32 %s3240_s23, 4  ;;  %p2836_p13 = pneg %p3366_p12  ;;  %s314_s24 = int_to_ptr.vmem [resolvable:$true] %s313_s24 }
  0x1e   : > { %s42_s26 = sadd.s32 1, %s3234_s13  ;;  %s3382_s27 = sand.u32 1, %s3226_s11  }
  0x1f   : > { %p3376_p4 = pnand %p2836_p13, %p5087_p3  ;;  %p3384_p2 = scmp.ge.s32.totalorder %s42_s26, 2 }
  0x20   : > { %s2995_s29 = scalar_lea.vmem %s314_s24, 1024  ;;  %p3003_p0 = scmp.lt.s32.totalorder %s314_s24, %s314_s24 }
  0x21   : > { %p2986_p6 = pneg %p3376_p4  ;;  %p2996_p10 = scmp.ne.s32.totalorder %s314_s24, %s2995_s29 }
  0x22   : > { %p3004_p3 = scmp.lt.s32.totalorder %s2995_s29, %s2995_s29 }
  0x23   : > { %p2998_p11 = pnand %p2996_p10, %p2986_p6 }
  0x24   : > { %p3005_p1 = por %p3004_p3, %p3003_p0 }
  0x25   : > { %p2999_p13 = pneg %p2998_p11 }
  0x27   : > { %p3006_p9 = pnand %p3005_p1, %p2999_p13 }
  0x29   : > { %3009 = shalt.err (!%p3006_p9)
}
  0x2a   : > { %s5093_s16 = smov 128   ;;  %s5095_s23 = smov 8  }
  0x2b   : > { %s5175_s3 = sld [smem:[#allocation147_spill]]  ;;  %s5482_s26 = smov (%p3384_p2, %s42_s26), 0 }
  0x2c   : > { %5176 = sst [smem:[#allocation27_spill]] %s5482_s26  ;;  %s3406_s21 = smul.u32 3584, %s3234_s13 }
  0x2d   : > { %p5177_p3 = scmp.lt.s32.totalorder %s3238_s14, 2  ;;  %s46_s9 = ssub.s32 %s3234_s13, %s5482_s26 }
  0x2e   : > { %s386_s20 = sand.u32 1, %s3238_s14   ;;  %p49_p0 = scmp.eq.s32.totalorder %s46_s9, 0 }
  0x2f   : > { %p3412_p9 = pnand %p5177_p3, %p3346_p5  ;;  %s2505_s17 = sshll.u32 %s3382_s27, 4 }
  0x30   : > { %s5181_s1 = sld [smem:[#allocation146_spill]]  ;;  %s390_s18 = scalar_lea.vmem [#allocation7], %s2505_s17 }
  0x31   : > { %2839 = dma.hbm_to_vmem [thread:$0]  (!%p3376_p4), %s5175_s3, 1024, %s314_s24, [#allocation11], %s5093_s16, %s5093_s16, %s5095_s23  }
  0x32   : > { %s5179_s24 = sadd.s32 1, %s3226_s11  ;;  %s403_s3 = sshll.u32 %s390_s18, 4  ;;  %s404_s3 = int_to_ptr.vmem [resolvable:$true] %s403_s3 }
  0x33   : > { %s3423_s28 = scalar_select %p49_p0, %s3226_s11, %s5179_s24  }
  0x34   : > { %s3429_s12 = scalar_lea.sflag [#allocation8], %s386_s20  ;;  %p3012_p5 = pneg %p3412_p9 }
  0x35   : > { %5180 = sst [smem:[#allocation28_spill]] %s3423_s28  ;;  %s3023_s8 = scalar_lea.vmem %s404_s3, 256 }
  0x36   : > { %s402_s23 = scalar_lea.hbm %s5181_s1, %s3406_s21  ;;  %p3024_p1 = scmp.ne.s32.totalorder %s404_s3, %s3023_s8 }
  0x37   : > { %s3243_s9 = smov [#allocation7]  }
  0x38   : > { %p3026_p2 = pnand %p3024_p1, %p3012_p5  ;;  %s3028_s24 = sshll.u32 %s3243_s9, 4  ;;  %s3029_s24 = int_to_ptr.vmem [resolvable:$false] %s3028_s24 }
  0x39   : > { %s3030_s26 = scalar_lea.vmem %s3029_s24, 512  ;;  %p3031_p11 = scmp.lt.s32.totalorder %s404_s3, %s3029_s24 }
  0x3a   : > { %p3027_p10 = pneg %p3026_p2  ;;  %p3032_p13 = scmp.lt.s32.totalorder %s3030_s26, %s3023_s8 }
  0x3c   : > { %p3033_p3 = por %p3032_p13, %p3031_p11 }
  0x3e   : > { %p3034_p0 = pnand %p3033_p3, %p3027_p10 }
  0x40   : > { %3037 = shalt.err (!%p3034_p0)
}
  0x41   : > { %s5182_s20 = smov 8   ;;  %s5183_s16 = smov 128  }
  0x42   : > { %2852 = dma.hbm_to_vmem [thread:$0]  (!%p3412_p9), %s402_s23, 256, %s404_s3, %s3429_s12, %s5183_s16, %s5183_s16, %s5182_s20  }
  0x43   : > { %s417_s29 = scalar_lea.vmem [#allocation9], %s2505_s17  ;;  %s3244_s9 = smov [#allocation12]  }
  0x44   : > { %s430_s18 = sshll.u32 %s417_s29, 4  ;;  %s329_s1 = sshll.u32 %s3244_s9, 4  ;;  %s3442_s18 = int_to_ptr.vmem [resolvable:$true] %s430_s18  ;;  %s330_s1 = int_to_ptr.vmem [resolvable:$true] %s329_s1 }
  0x45   : > { %s3049_s24 = scalar_lea.vmem %s330_s1, 192  ;;  %p3057_p11 = scmp.lt.s32.totalorder %s330_s1, %s330_s1 }
  0x46   : > { %p3050_p1 = scmp.ne.s32.totalorder %s330_s1, %s3049_s24  ;;  %p3058_p13 = scmp.lt.s32.totalorder %s3049_s24, %s3049_s24 }
  0x48   : > { %p3052_p2 = pnand %p3050_p1, %p2986_p6  ;;  %p3059_p3 = por %p3058_p13, %p3057_p11 }
  0x4a   : > { %p3053_p10 = pneg %p3052_p2 }
  0x4c   : > { %p3060_p0 = pnand %p3059_p3, %p3053_p10 }
  0x4e   : > { %3063 = shalt.err (!%p3060_p0)
}
  0x4f   : > { %s3245_s8 = smov 64   ;;  %s3246_s3 = smov 4  }
  0x50   : > { %s5184_s5 = sld [smem:[#allocation148_spill]]  ;;  %s3247_s17 = smov [#allocation13]  }
  0x51   : > { %s345_s29 = sshll.u32 %s3247_s17, 4  ;;  %s2810_s9 = smul.u32 224, %s3382_s27  ;;  %s346_s29 = int_to_ptr.vmem [resolvable:$true] %s345_s29 }
  0x52   : > { %s3075_s13 = scalar_lea.vmem %s346_s29, 2048  ;;  %p3083_p11 = scmp.lt.s32.totalorder %s346_s29, %s346_s29 }
  0x53   : > { %p3076_p1 = scmp.ne.s32.totalorder %s346_s29, %s3075_s13  ;;  %p3084_p13 = scmp.lt.s32.totalorder %s3075_s13, %s3075_s13 }
  0x55   : > { %p3078_p2 = pnand %p3076_p1, %p2986_p6  ;;  %p3085_p3 = por %p3084_p13, %p3083_p11 }
  0x56   : > { %2842 = dma.hbm_to_vmem [thread:$0]  (!%p3376_p4), %s5184_s5, 192, %s330_s1, [#allocation11], %s3245_s8, %s3245_s8, %s3246_s3  }
  0x57   : > { %p3079_p10 = pneg %p3078_p2 }
  0x59   : > { %p3086_p0 = pnand %p3085_p3, %p3079_p10 }
  0x5b   : > { %3089 = shalt.err (!%p3086_p0)
}
  0x5c   : > { %2845 = dma.hbm_to_vmem [thread:$0]  (!%p3376_p4), %s5084_s7, 2048, %s346_s29, [#allocation14], %s5183_s16, %s5183_s16, %s5182_s20  }
  0x5d   : > { %s375_s13 = scalar_lea.hbm %s5077_s0, %s3406_s21  ;;  %s366_s26 = scalar_lea.vmem [#allocation4], %s2810_s9 }
  0x5e   : > { %s376_s23 = sshll.u32 %s366_s26, 4  ;;  %s2555_s17 = sadd.s32 3328, %s3406_s21  ;;  %s377_s23 = int_to_ptr.vmem [resolvable:$true] %s376_s23 }
  0x5f   : > { %s3472_s28 = scalar_lea.hbm %s5079_s2, %s2555_s17  ;;  %s363_s11 = scalar_lea.sflag [#allocation5], %s3382_s27 }
  0x60   : > { %s3103_s1 = scalar_lea.vmem %s377_s23, 3584  ;;  %s3248_s29 = smov [#allocation4]  }
  0x61   : > { %p3104_p6 = scmp.ne.s32.totalorder %s377_s23, %s3103_s1  ;;  %s3108_s24 = sshll.u32 %s3248_s29, 4  ;;  %s3109_s24 = int_to_ptr.vmem [resolvable:$false] %s3108_s24 }
  0x62   : > { %s3110_s8 = scalar_lea.vmem %s3109_s24, 7168  ;;  %p3111_p2 = scmp.lt.s32.totalorder %s377_s23, %s3109_s24 }
  0x63   : > { %p3106_p1 = pnand %p3104_p6, %p3012_p5  ;;  %p3112_p10 = scmp.lt.s32.totalorder %s3110_s8, %s3103_s1 }
  0x65   : > { %p3107_p4 = pneg %p3106_p1  ;;  %p3113_p11 = por %p3112_p10, %p3111_p2 }
  0x67   : > { %p3114_p13 = pnand %p3113_p11, %p3107_p4 }
  0x69   : > { %3117 = shalt.err (!%p3114_p13)
}
  0x6a   : > { %2849 = dma.hbm_to_vmem [thread:$0]  (!%p3412_p9), %s375_s13, 3584, %s377_s23, %s363_s11, %s5183_s16, %s5183_s16, %s5182_s20  }
  0x6b   : > { %s3131_s5 = scalar_lea.vmem %s3442_s18, 256  ;;  %s3249_s21 = smov [#allocation9]  }
  0x6c   : > { %p3132_p3 = scmp.ne.s32.totalorder %s3442_s18, %s3131_s5  ;;  %s3136_s27 = sshll.u32 %s3249_s21, 4  ;;  %s3137_s27 = int_to_ptr.vmem [resolvable:$false] %s3136_s27 }
  0x6d   : > { %s3138_s9 = scalar_lea.vmem %s3137_s27, 512  ;;  %p3139_p1 = scmp.lt.s32.totalorder %s3442_s18, %s3137_s27 }
  0x6e   : > { %p3134_p0 = pnand %p3132_p3, %p3012_p5  ;;  %p3140_p4 = scmp.lt.s32.totalorder %s3138_s9, %s3131_s5 }
  0x70   : > { %p3135_p6 = pneg %p3134_p0  ;;  %p3141_p2 = por %p3140_p4, %p3139_p1 }
  0x72   : > { %p3142_p10 = pnand %p3141_p2, %p3135_p6 }
  0x74   : > { %3145 = shalt.err (!%p3142_p10)
}
  0x75   : > { %2855 = dma.hbm_to_vmem [thread:$0]  (!%p3412_p9), %s3472_s28, 256, %s3442_s18, %s3429_s12, %s5183_s16, %s5183_s16, %s5182_s20  }
  0x76   : > { %442 = sbr.rel (%p3366_p12) target bundleno = 801 (0x321), region = 56 }
  0x7b   : > { %s3500_s11 = sand.u32 1, %s3222_s10  }
  0x7c   : > { %s2814_s3 = smul.u32 224, %s3500_s11  ;;  %s445_s13 = scalar_lea.sflag [#allocation5], %s3500_s11 }
  0x7e   : > { %s3506_s30 = scalar_lea.vmem [#allocation4], %s2814_s3 }
  0x7f   : > { %3197 = dma.done.wait (%p3352_p7), %s445_s13, 3584  }
  0x80   : > { %3199 = vsyncadd (%p3352_p7), %s445_s13, 4294963712  ;;  %s453_s12 = sand.u32 1, %s3335_s15   ;;  %s2510_s22 = sshll.u32 %s3500_s11, 4 }
  0x81   : > { %s454_s28 = scalar_lea.sflag [#allocation8], %s453_s12  ;;  %s457_s20 = scalar_lea.vmem [#allocation7], %s2510_s22 }
  0x82   : > { %3201 = dma.done.wait (%p3352_p7), %s454_s28, 512  }
  0x83   : > { %3203 = vsyncadd (%p3352_p7), %s454_s28, 4294966784  ;;  %s3518_s16 = scalar_lea.vmem [#allocation9], %s2510_s22  ;;  %p5185_p12 = scmp.eq.s32.totalorder %s3335_s15, 0 }
  0x85   : > { %3205 = dma.done.wait (%p5185_p12), [#allocation11], 1216   ;;  %p5186_p9 = pmov %p5185_p12 }
  0x87   : > { %3207 = vsyncadd (%p5186_p9), [#allocation11], 4294966080  ;;  %p5187_p5 = pmov %p5186_p9 }
  0x89   : > { %3209 = dma.done.wait (%p5187_p5), [#allocation14], 2048   ;;  %p5188_p11 = pmov %p5187_p5 }
  0x8a   : > { %v637_v0 = vld [vmem:[#allocation10 + $0x38] sm:$0xff]  ;;  %v636_v1 = vld [vmem:[#allocation10 + $0x30] sm:$0xff]  ;;  %vm535_vm0 = vcmask 523264   ;;  %v635_v2 = vld [vmem:[#allocation10 + $0x28] sm:$0xff]  ;;  %s5466_s29 = sld [smem:[#allocation149_spill]]  ;;  %s4965_s24 = scalar_lea.vmem [#allocation15], %s2814_s3 }
  0x8b   : > { %3211 = vsyncadd (%p5188_p11), [#allocation14], 4294965248  ;;  %2640 = vmatprep.subr.mxu0 %v637_v0  ;;  %v634_v3 = vld [vmem:[#allocation10 + $0x20] sm:$0xff]  ;;  %v534_v5 = vld [vmem:[%s457_s20 + $0x8] sm:$0xff]  ;;  %s5467_s8 = sld [smem:[#allocation23_spill]]  ;;  %s2332_s27 = sshll.u32 %s4965_s24, 4  ;;  %s5028_s27 = int_to_ptr.vmem [resolvable:$true] %s2332_s27 }
  0x8c   : > { %2641 = vmatpush3.msra.mxu0 %v637_v0  ;;  %v533_v4 = vld [vmem:[%s457_s20] sm:$0xff]  ;;  %v539_v7 = vld [vmem:[%s3506_s30 + $0x8] sm:$0xff]  ;;  %v633_v8 = vld [vmem:[#allocation10 + $0x18] sm:$0xff]  ;;  %537 = vst.msk [vmem:[#allocation2 + $0x8] sm:$0xff] %vm535_vm0, %v534_v5  ;;  %s5469_s13 = sld [smem:[#allocation150_spill]]  ;;  %s2316_s12 = scalar_lea.sflag [#allocation6], %s3500_s11 }
  0x8d   : > { %2642 = vmatprep.subr.mxu0 %v636_v1  ;;  %536 = vst.msk [vmem:[#allocation2] sm:$0xff] %vm535_vm0, %v533_v4  ;;  %v538_v6 = vld [vmem:[%s3506_s30] sm:$0xff]  ;;  %567 = vst.msk [vmem:[#allocation2 + $0x18] sm:$0xff] %vm535_vm0, %v539_v7  ;;  %v540_v9 = vld [vmem:[%s3506_s30 + $0x10] sm:$0xff]  ;;  %s3146_s28 = scalar_lea.vmem %s5028_s27, 3584  ;;  %s3251_s20 = smov [#allocation15]  }
  0x8e   : > { %2643 = vmatpush3.msra.mxu0 %v636_v1  ;;  %566 = vst.msk [vmem:[#allocation2 + $0x10] sm:$0xff] %vm535_vm0, %v538_v6  ;;  %v541_v10 = vld [vmem:[%s3506_s30 + $0x18] sm:$0xff]  ;;  %v542_v11 = vld [vmem:[%s3506_s30 + $0x20] sm:$0xff]  ;;  %568 = vst.msk [vmem:[#allocation2 + $0x20] sm:$0xff] %vm535_vm0, %v540_v9  ;;  %p3147_p7 = scmp.ne.s32.totalorder %s5028_s27, %s3146_s28 }
  0x8f   : > { %2644 = vmatprep.subr.mxu0 %v635_v2  ;;  %569 = vst.msk [vmem:[#allocation2 + $0x28] sm:$0xff] %vm535_vm0, %v541_v10  ;;  %570 = vst.msk [vmem:[#allocation2 + $0x30] sm:$0xff] %vm535_vm0, %v542_v11  ;;  %v543_v12 = vld [vmem:[%s3506_s30 + $0x28] sm:$0xff]  ;;  %v544_v13 = vld [vmem:[%s3506_s30 + $0x30] sm:$0xff] }
  0x90   : > { %v545_v14 = vld [vmem:[%s3506_s30 + $0x38] sm:$0xff]  ;;  %2645 = vmatpush3.msra.mxu0 %v635_v2  ;;  %v632_v15 = vld [vmem:[#allocation10 + $0x10] sm:$0xff]  ;;  %571 = vst.msk [vmem:[#allocation2 + $0x38] sm:$0xff] %vm535_vm0, %v543_v12  ;;  %572 = vst.msk [vmem:[#allocation2 + $0x40] sm:$0xff] %vm535_vm0, %v544_v13  ;;  %p3148_p13 = pnand %p3147_p7, %p3356_p8 }
  0x91   : > { %573 = vst.msk [vmem:[#allocation2 + $0x48] sm:$0xff] %vm535_vm0, %v545_v14  ;;  %v546_v16 = vld [vmem:[%s3506_s30 + $0x40] sm:$0xff]  ;;  %v547_v17 = vld [vmem:[%s3506_s30 + $0x48] sm:$0xff]  ;;  %v548_v18 = vld [vmem:[%s3506_s30 + $0x50] sm:$0xff]  ;;  %2646 = vmatprep.subr.mxu0 %v634_v3  ;;  %s2815_s21 = smul.u32 3584, %s5467_s8 }
  0x92   : > { %574 = vst.msk [vmem:[#allocation2 + $0x50] sm:$0xff] %vm535_vm0, %v546_v16  ;;  %575 = vst.msk [vmem:[#allocation2 + $0x58] sm:$0xff] %vm535_vm0, %v547_v17  ;;  %v549_v19 = vld [vmem:[%s3506_s30 + $0x58] sm:$0xff]  ;;  %v550_v20 = vld [vmem:[%s3506_s30 + $0x60] sm:$0xff]  ;;  %2647 = vmatpush3.msra.mxu0 %v634_v3  ;;  %s5470_s22 = smov %s5469_s13  ;;  %p3149_p3 = pneg %p3148_p13 }
  0x93   : > { %576 = vst.msk [vmem:[#allocation2 + $0x60] sm:$0xff] %vm535_vm0, %v548_v18  ;;  %v551_v21 = vld [vmem:[%s3506_s30 + $0x68] sm:$0xff]  ;;  %577 = vst.msk [vmem:[#allocation2 + $0x68] sm:$0xff] %vm535_vm0, %v549_v19  ;;  %v552_v23 = vld [vmem:[%s3506_s30 + $0x70] sm:$0xff]  ;;  %2648 = vmatprep.subr.mxu0 %v633_v8 }
  0x94   : > { %v631_v22 = vld [vmem:[#allocation10 + $0x8] sm:$0xff]  ;;  %578 = vst.msk [vmem:[#allocation2 + $0x70] sm:$0xff] %vm535_vm0, %v550_v20  ;;  %579 = vst.msk [vmem:[#allocation2 + $0x78] sm:$0xff] %vm535_vm0, %v551_v21  ;;  %v553_v24 = vld [vmem:[%s3506_s30 + $0x78] sm:$0xff]  ;;  %2649 = vmatpush3.msra.mxu0 %v633_v8  ;;  %v966_v20 = vlaneseq }
  0x95   : > { %v554_v25 = vld [vmem:[%s3506_s30 + $0x80] sm:$0xff]  ;;  %580 = vst.msk [vmem:[#allocation2 + $0x80] sm:$0xff] %vm535_vm0, %v552_v23  ;;  %581 = vst.msk [vmem:[#allocation2 + $0x88] sm:$0xff] %vm535_vm0, %v553_v24  ;;  %v555_v26 = vld [vmem:[%s3506_s30 + $0x88] sm:$0xff]  ;;  %2650 = vmatprep.subr.mxu0 %v632_v15 }
  0x96   : > { %582 = vst.msk [vmem:[#allocation2 + $0x90] sm:$0xff] %vm535_vm0, %v554_v25  ;;  %v556_v27 = vld [vmem:[%s3506_s30 + $0x90] sm:$0xff]  ;;  %v557_v28 = vld [vmem:[%s3506_s30 + $0x98] sm:$0xff]  ;;  %v598_v29 = vld [vmem:[#allocation2] sm:$0xff]  ;;  %2651 = vmatpush3.msra.mxu0 %v632_v15  ;;  %v3616_v21 = vshrl.u32 %v966_v20, 7 }
  0x97   : > { %583 = vst.msk [vmem:[#allocation2 + $0x98] sm:$0xff] %vm535_vm0, %v555_v26  ;;  %584 = vst.msk [vmem:[#allocation2 + $0xa0] sm:$0xff] %vm535_vm0, %v556_v27  ;;  %v558_v30 = vld [vmem:[%s3506_s30 + $0xa0] sm:$0xff]  ;;  %v559_v31 = vld [vmem:[%s3506_s30 + $0xa8] sm:$0xff]  ;;  %2656 = vmatprep.mubr.msk.f32.mxu0 %vm535_vm0, %v598_v29  ;;  %2652 = vmatprep.subr.mxu0 %v631_v22 }
  0x98   : > { %585 = vst.msk [vmem:[#allocation2 + $0xa8] sm:$0xff] %vm535_vm0, %v557_v28  ;;  %586 = vst.msk [vmem:[#allocation2 + $0xb0] sm:$0xff] %vm535_vm0, %v558_v30  ;;  %v630_v32 = vld [vmem:[#allocation10] sm:$0xff]  ;;  %2653 = vmatpush3.msra.mxu0 %v631_v22  ;;  %v599_v33 = vld [vmem:[#allocation2 + $0x8] sm:$0xff]  ;;  %v968_v22 = vadd.s32 8, %v3616_v21  ;;  %v1194_v23 = vsub.s32 0, %v3616_v21 }
  0x99   : > { %587 = vst.msk [vmem:[#allocation2 + $0xb8] sm:$0xff] %vm535_vm0, %v559_v31  ;;  %2654 = vmatprep.subr.mxu0 %v630_v32  ;;  %v600_v34 = vld [vmem:[#allocation2 + $0x10] sm:$0xff]  ;;  %v601_v35 = vld [vmem:[#allocation2 + $0x18] sm:$0xff]  ;;  %v602_v36 = vld [vmem:[#allocation2 + $0x20] sm:$0xff]  ;;  %v1254_v24 = vsub.s32 1, %v3616_v21  ;;  %v3250_v31 = vmov 0.0  }
  0x9a   : > { %2655 = vmatpush3.msra.mxu0 %v630_v32  ;;  %v560_v37 = vld [vmem:[%s3506_s30 + $0xb0] sm:$0xff]  ;;  %v561_v38 = vld [vmem:[%s3506_s30 + $0xb8] sm:$0xff]  ;;  %v562_v39 = vld [vmem:[%s3506_s30 + $0xc0] sm:$0xff]  ;;  %vm970_vm1 = vcmp.lt.s32.totalorder %v968_v22, 14  ;;  %v3630_v32 = vrot.slane %v3250_v31, 7  ;;  %vm1106_vm2 = vcmp.lt.s32.totalorder %v3616_v21, 1 }
  0x9b   : > { %2657 = vmatmul.mubr.msk.f32.vlgmr.msra.gmra.mxu0 %vm535_vm0, %v599_v33  ;;  %588 = vst.msk [vmem:[#allocation2 + $0xc0] sm:$0xff] %vm535_vm0, %v560_v37  ;;  %v563_v40 = vld [vmem:[%s3506_s30 + $0xc8] sm:$0xff]  ;;  %589 = vst.msk [vmem:[#allocation2 + $0xc8] sm:$0xff] %vm535_vm0, %v561_v38  ;;  %v564_v41 = vld [vmem:[%s3506_s30 + $0xd0] sm:$0xff]  ;;  %v1314_v37 = vsub.s32 2, %v3616_v21  ;;  %vm1163_vm3 = vcmp.lt.s32.totalorder %v3616_v21, 7 }
  0x9c   : > { %2659 = vmatprep.mubr.msk.f32.mxu0 %vm535_vm0, %v600_v34  ;;  %590 = vst.msk [vmem:[#allocation2 + $0xd0] sm:$0xff] %vm535_vm0, %v562_v39  ;;  %591 = vst.msk [vmem:[#allocation2 + $0xd8] sm:$0xff] %vm535_vm0, %v563_v40  ;;  %v565_v42 = vld [vmem:[%s3506_s30 + $0xd8] sm:$0xff]  ;;  %v603_v43 = vld [vmem:[#allocation2 + $0x28] sm:$0xff]  ;;  %v3632_v34 = vsel %vm970_vm1, 1.0, %v3250_v31  ;;  %s5024_s30 = scalar_lea.hbm %s5469_s13, %s2815_s21 }
  0x9d   : > { %592 = vst.msk [vmem:[#allocation2 + $0xe0] sm:$0xff] %vm535_vm0, %v564_v41  ;;  %593 = vst.msk [vmem:[#allocation2 + $0xe8] sm:$0xff] %vm535_vm0, %v565_v42  ;;  %v604_v44 = vld [vmem:[#allocation2 + $0x30] sm:$0xff]  ;;  %v605_v45 = vld [vmem:[#allocation2 + $0x38] sm:$0xff] }
  0x9e   : > { %v606_v46 = vld [vmem:[#allocation2 + $0x40] sm:$0xff]  ;;  %v607_v47 = vld [vmem:[#allocation2 + $0x48] sm:$0xff]  ;;  %v608_v48 = vld [vmem:[#allocation2 + $0x50] sm:$0xff] }
  0x9f   : > { %2660 = vmatmul.mubr.msk.f32.gmra.mxu0 %vm535_vm0, %v601_v35  ;;  %v609_v49 = vld [vmem:[#allocation2 + $0x58] sm:$0xff]  ;;  %v610_v50 = vld [vmem:[#allocation2 + $0x60] sm:$0xff]  ;;  %v611_v51 = vld [vmem:[#allocation2 + $0x68] sm:$0xff] }
  0xa0   : > { %2662 = vmatprep.mubr.msk.f32.mxu0 %vm535_vm0, %v602_v36  ;;  %v612_v52 = vld [vmem:[#allocation2 + $0x70] sm:$0xff]  ;;  %v613_v53 = vld [vmem:[#allocation2 + $0x78] sm:$0xff]  ;;  %v614_v54 = vld [vmem:[#allocation2 + $0x80] sm:$0xff] }
  0xa1   : > { %v615_v55 = vld [vmem:[#allocation2 + $0x88] sm:$0xff]  ;;  %v616_v56 = vld [vmem:[#allocation2 + $0x90] sm:$0xff]  ;;  %v617_v57 = vld [vmem:[#allocation2 + $0x98] sm:$0xff] }
  0xa2   : > { %v618_v58 = vld [vmem:[#allocation2 + $0xa0] sm:$0xff]  ;;  %v619_v59 = vld [vmem:[#allocation2 + $0xa8] sm:$0xff]  ;;  %v620_v60 = vld [vmem:[#allocation2 + $0xb0] sm:$0xff] }
  0xa3   : > { %2663 = vmatmul.mubr.msk.f32.gmra.mxu0 %vm535_vm0, %v603_v43  ;;  %v621_v61 = vld [vmem:[#allocation2 + $0xb8] sm:$0xff]  ;;  %v622_v62 = vld [vmem:[#allocation2 + $0xc0] sm:$0xff]  ;;  %v623_v63 = vld [vmem:[#allocation2 + $0xc8] sm:$0xff] }
  0xa4   : > { %2665 = vmatprep.mubr.msk.f32.mxu0 %vm535_vm0, %v604_v44  ;;  %v624_v0 = vld [vmem:[#allocation2 + $0xd0] sm:$0xff]  ;;  %v625_v1 = vld [vmem:[#allocation2 + $0xd8] sm:$0xff]  ;;  %v626_v2 = vld [vmem:[#allocation2 + $0xe0] sm:$0xff] }
  0xa5   : > { %v627_v3 = vld [vmem:[#allocation2 + $0xe8] sm:$0xff]  ;;  %v2073_v5 = vld [vmem:[#allocation13 + $0x70] sm:$0xff]  ;;  %v2072_v6 = vld [vmem:[#allocation13 + $0x68] sm:$0xff] }
  0xa6   : > { %v2074_v4 = vld [vmem:[#allocation13 + $0x78] sm:$0xff]  ;;  %v2071_v7 = vld [vmem:[#allocation13 + $0x60] sm:$0xff]  ;;  %v2069_v9 = vld [vmem:[#allocation13 + $0x50] sm:$0xff] }
  0xa7   : > { %2666 = vmatmul.mubr.msk.f32.gmra.mxu0 %vm535_vm0, %v605_v45  ;;  %2778 = vmatprep.subr.mxu1 %v2074_v4  ;;  %v2070_v8 = vld [vmem:[#allocation13 + $0x58] sm:$0xff]  ;;  %v2068_v10 = vld [vmem:[#allocation13 + $0x48] sm:$0xff]  ;;  %v2067_v11 = vld [vmem:[#allocation13 + $0x40] sm:$0xff]  ;;  %v3647_v45 = vrot.slane %v3250_v31, 1 }
  0xa8   : > { %2668 = vmatprep.mubr.msk.f32.mxu0 %vm535_vm0, %v606_v46  ;;  %2704 = vmatprep.subr.mxu0 %v2074_v4  ;;  %v2066_v12 = vld [vmem:[#allocation13 + $0x38] sm:$0xff]  ;;  %v2065_v13 = vld [vmem:[#allocation13 + $0x30] sm:$0xff]  ;;  %v2064_v14 = vld [vmem:[#allocation13 + $0x28] sm:$0xff] }
  0xa9   : > { %2794 = vmatpush3.msra.mxu1 %v2074_v4  ;;  %2705 = vmatpush3.msra.mxu0 %v2074_v4  ;;  %v2063_v15 = vld [vmem:[#allocation13 + $0x20] sm:$0xff]  ;;  %v2062_v16 = vld [vmem:[#allocation13 + $0x18] sm:$0xff]  ;;  %v2061_v17 = vld [vmem:[#allocation13 + $0x10] sm:$0xff]  ;;  %5189 = vst [vmem:[#allocation29_spill] sm:$0xff] %v3647_v45 }
  0xaa   : > { %2779 = vmatprep.subr.mxu1 %v2073_v5  ;;  %2706 = vmatprep.subr.mxu0 %v2073_v5  ;;  %v2060_v18 = vld [vmem:[#allocation13 + $0x8] sm:$0xff]  ;;  %v2059_v19 = vld [vmem:[#allocation13] sm:$0xff]  ;;  %v1047_v26 = vld [vmem:[#allocation12] sm:$0x7] }
  0xab   : > { %2669 = vmatmul.mubr.msk.f32.gmra.mxu0 %vm535_vm0, %v607_v47  ;;  %2795 = vmatpush3.msra.mxu1 %v2073_v5  ;;  %v3624_v28 = vld [vmem:[%s5081_s4] ss:$0 sm:$0xff]  ;;  %v3626_v29 = vrot.slane %v1047_v26, %v1194_v23  ;;  %v3628_v30 = vrot.slane %v1047_v26, %v1254_v24  ;;  %v1048_v36 = vld [vmem:[#allocation12 + $0x4] sm:$0x7]  ;;  %v1049_v43 = vld [vmem:[#allocation12 + $0x8] sm:$0x7] }
  0xac   : > { %2671 = vmatprep.mubr.msk.f32.mxu0 %vm535_vm0, %v608_v48  ;;  %2707 = vmatpush3.msra.mxu0 %v2073_v5  ;;  %v3645_v44 = vrot.slane %v1048_v36, %v1254_v24  ;;  %v3649_v48 = vrot.slane %v1047_v26, %v1314_v37 }
  0xad   : > { %2780 = vmatprep.subr.mxu1 %v2072_v6  ;;  %2708 = vmatprep.subr.mxu0 %v2072_v6  ;;  %v1197_v41 = vmul.f32 %v3626_v29, %v3630_v32  ;;  %v3641_v42 = vmul.f32 0.0, %v3628_v30 }
  0xae   : > { %2796 = vmatpush3.msra.mxu1 %v2072_v6  ;;  %2709 = vmatpush3.msra.mxu0 %v2072_v6  ;;  %v3684_v4 = vmul.f32 %v3649_v48, %v3647_v45 }
  0xaf   : > { %2672 = vmatmul.mubr.msk.f32.gmra.mxu0 %vm535_vm0, %v609_v49  ;;  %2781 = vmatprep.subr.mxu1 %v2071_v7  ;;  %v3651_v49 = vrot.slane %v1048_v36, %v1194_v23 }
  0xb0   : > { %2674 = vmatprep.mubr.msk.f32.mxu0 %vm535_vm0, %v610_v50  ;;  %2710 = vmatprep.subr.mxu0 %v2071_v7  ;;  %v3653_v50 = vrot.slane %v1049_v43, %v1194_v23 }
  0xb1   : > { %2797 = vmatpush3.msra.mxu1 %v2071_v7  ;;  %2711 = vmatpush3.msra.mxu0 %v2071_v7 }
  0xb2   : > { %2782 = vmatprep.subr.mxu1 %v2070_v8  ;;  %2712 = vmatprep.subr.mxu0 %v2070_v8 }
  0xb3   : > { %2675 = vmatmul.mubr.msk.f32.gmra.mxu0 %vm535_vm0, %v611_v51  ;;  %2798 = vmatpush3.msra.mxu1 %v2070_v8 }
  0xb4   : > { %2677 = vmatprep.mubr.msk.f32.mxu0 %vm535_vm0, %v612_v52  ;;  %2713 = vmatpush3.msra.mxu0 %v2070_v8  ;;  %v3655_v52 = vrot.slane %v1048_v36, %v1314_v37 }
  0xb5   : > { %2783 = vmatprep.subr.mxu1 %v2069_v9  ;;  %2714 = vmatprep.subr.mxu0 %v2069_v9 }
  0xb6   : > { %2799 = vmatpush3.msra.mxu1 %v2069_v9  ;;  %2715 = vmatpush3.msra.mxu0 %v2069_v9 }
  0xb7   : > { %2678 = vmatmul.mubr.msk.f32.gmra.mxu0 %vm535_vm0, %v613_v53  ;;  %2784 = vmatprep.subr.mxu1 %v2068_v10 }
  0xb8   : > { %2680 = vmatprep.mubr.msk.f32.mxu0 %vm535_vm0, %v614_v54  ;;  %2716 = vmatprep.subr.mxu0 %v2068_v10 }
  0xb9   : > { %2800 = vmatpush3.msra.mxu1 %v2068_v10  ;;  %2717 = vmatpush3.msra.mxu0 %v2068_v10 }
  0xba   : > { %2785 = vmatprep.subr.mxu1 %v2067_v11  ;;  %2718 = vmatprep.subr.mxu0 %v2067_v11 }
  0xbb   : > { %2681 = vmatmul.mubr.msk.f32.gmra.mxu0 %vm535_vm0, %v615_v55  ;;  %2801 = vmatpush3.msra.mxu1 %v2067_v11 }
  0xbc   : > { %2683 = vmatprep.mubr.msk.f32.mxu0 %vm535_vm0, %v616_v56  ;;  %2719 = vmatpush3.msra.mxu0 %v2067_v11  ;;  %v3661_v56 = vrot.slane %v1049_v43, %v1254_v24 }
  0xbd   : > { %2786 = vmatprep.subr.mxu1 %v2066_v12  ;;  %2720 = vmatprep.subr.mxu0 %v2066_v12 }
  0xbe   : > { %2802 = vmatpush3.msra.mxu1 %v2066_v12  ;;  %2721 = vmatpush3.msra.mxu0 %v2066_v12 }
  0xbf   : > { %2684 = vmatmul.mubr.msk.f32.gmra.mxu0 %vm535_vm0, %v617_v57  ;;  %2787 = vmatprep.subr.mxu1 %v2065_v13  ;;  %v1285_v57 = vadd.f32 %v3641_v42, %v1197_v41 }
  0xc0   : > { %2686 = vmatprep.mubr.msk.f32.mxu0 %vm535_vm0, %v618_v58  ;;  %2722 = vmatprep.subr.mxu0 %v2065_v13 }
  0xc1   : > { %2803 = vmatpush3.msra.mxu1 %v2065_v13  ;;  %2723 = vmatpush3.msra.mxu0 %v2065_v13 }
  0xc2   : > { %2788 = vmatprep.subr.mxu1 %v2064_v14  ;;  %2724 = vmatprep.subr.mxu0 %v2064_v14 }
  0xc3   : > { %2687 = vmatmul.mubr.msk.f32.gmra.mxu0 %vm535_vm0, %v619_v59  ;;  %2804 = vmatpush3.msra.mxu1 %v2064_v14 }
  0xc4   : > { %2689 = vmatprep.mubr.msk.f32.mxu0 %vm535_vm0, %v620_v60  ;;  %2725 = vmatpush3.msra.mxu0 %v2064_v14  ;;  %v3666_v60 = vrot.slane %v1049_v43, %v1314_v37 }
  0xc5   : > { %2789 = vmatprep.subr.mxu1 %v2063_v15  ;;  %2726 = vmatprep.subr.mxu0 %v2063_v15 }
  0xc6   : > { %2805 = vmatpush3.msra.mxu1 %v2063_v15  ;;  %2727 = vmatpush3.msra.mxu0 %v2063_v15 }
  0xc7   : > { %2690 = vmatmul.mubr.msk.f32.gmra.mxu0 %vm535_vm0, %v621_v61  ;;  %2790 = vmatprep.subr.mxu1 %v2062_v16 }
  0xc8   : > { %2692 = vmatprep.mubr.msk.f32.mxu0 %vm535_vm0, %v622_v62  ;;  %2728 = vmatprep.subr.mxu0 %v2062_v16 }
  0xc9   : > { %2806 = vmatpush3.msra.mxu1 %v2062_v16  ;;  %2729 = vmatpush3.msra.mxu0 %v2062_v16 }
  0xca   : > { %2791 = vmatprep.subr.mxu1 %v2061_v17  ;;  %2730 = vmatprep.subr.mxu0 %v2061_v17 }
  0xcb   : > { %2693 = vmatmul.mubr.msk.f32.gmra.mxu0 %vm535_vm0, %v623_v63  ;;  %2807 = vmatpush3.msra.mxu1 %v2061_v17 }
  0xcc   : > { %2695 = vmatprep.mubr.msk.f32.mxu0 %vm535_vm0, %v624_v0  ;;  %2731 = vmatpush3.msra.mxu0 %v2061_v17 }
  0xcd   : > { %2792 = vmatprep.subr.mxu1 %v2060_v18  ;;  %2732 = vmatprep.subr.mxu0 %v2060_v18 }
  0xce   : > { %2808 = vmatpush3.msra.mxu1 %v2060_v18  ;;  %2733 = vmatpush3.msra.mxu0 %v2060_v18 }
  0xcf   : > { %2696 = vmatmul.mubr.msk.f32.gmra.mxu0 %vm535_vm0, %v625_v1  ;;  %2793 = vmatprep.subr.mxu1 %v2059_v19 }
  0xd0   : > { %2698 = vmatprep.mubr.msk.f32.mxu0 %vm535_vm0, %v626_v2  ;;  %2734 = vmatprep.subr.mxu0 %v2059_v19 }
  0xd1   : > { %2809 = vmatpush3.msra.mxu1 %v2059_v19  ;;  %2735 = vmatpush3.msra.mxu0 %v2059_v19 }
  0xd3   : > { %2699 = vmatmul.mubr.msk.f32.gmra.mxu0 %vm535_vm0, %v627_v3 }
 0x15b   : > { %v2658_v25 = vpop.f32.mrf.mxu0 }
 0x15d   : > { %v807_v27 = vpop.f32.mrf.mxu0 }
 0x15f   : > { %v2661_v33 = vpop.f32.mrf.mxu0 }
 0x160   : > { %v823_v35 = vadd.f32 %v2661_v33, %v3624_v28 }
 0x161   : > { %v817_v38 = vpop.f32.mrf.mxu0 }
 0x162   : > { %v978_v39 = vmul.f32 %v3632_v34, %v823_v35  ;;  %v818_v40 = vadd.f32 %v3624_v28, %v817_v38 }
 0x163   : > { %v2664_v46 = vpop.f32.mrf.mxu0 }
 0x164   : > { %v1081_v47 = vrot.slane %v978_v39, 7  ;;  %v1138_v51 = vrot.slane %v978_v39, 1  ;;  %v3657_v53 = vrot.slane %v818_v40, 7  ;;  %v3659_v54 = vrot.slane %v818_v40, 1 }
 0x165   : > { %v827_v55 = vpop.f32.mrf.mxu0  ;;  %v833_v58 = vadd.f32 %v2664_v46, %v3624_v28  ;;  %v1258_v2 = vmul.f32 %v3628_v30, %v818_v40  ;;  %v1259_v10 = vmul.f32 %v3628_v30, %v978_v39  ;;  %v1449_v14 = vmul.f32 %v3645_v44, %v978_v39 }
 0x166   : > { %v828_v59 = vadd.f32 %v3624_v28, %v827_v55  ;;  %v1131_v61 = vsel %vm1106_vm2, %v3657_v53, %v1081_v47  ;;  %v1132_v62 = vsel %vm1106_vm2, %v3630_v32, %v3657_v53  ;;  %v1189_v63 = vsel %vm1163_vm3, %v3647_v45, %v3659_v54 }
 0x167   : > { %v2667_v0 = vpop.f32.mrf.mxu0  ;;  %v1198_v1 = vmul.f32 %v3626_v29, %v1132_v62  ;;  %v1317_v3 = vmul.f32 %v3649_v48, %v1189_v63  ;;  %v1188_v5 = vsel %vm1163_vm3, %v3659_v54, %v1138_v51  ;;  %v1199_v6 = vmul.f32 %v3626_v29, %v1131_v61 }
 0x168   : > { %v3691_v7 = vmul.f32 %v3632_v34, %v833_v58  ;;  %v3693_v8 = vrot.slane %v828_v59, 7  ;;  %v1389_v12 = vmul.f32 %v3651_v49, %v1131_v61  ;;  %v3697_v13 = vrot.slane %v828_v59, 1 }
 0x169   : > { %v837_v9 = vpop.f32.mrf.mxu0  ;;  %v1345_v11 = vadd.f32 %v1317_v3, %v1285_v57  ;;  %v1286_v15 = vadd.f32 %v1258_v2, %v1198_v1  ;;  %v3701_v16 = vmul.f32 %v3645_v44, %v818_v40  ;;  %v1318_v19 = vmul.f32 %v3649_v48, %v1188_v5 }
 0x16a   : > { %5190 = vst [vmem:[#allocation30_spill] sm:$0xff] %v3693_v8  ;;  %5191 = vst [vmem:[#allocation31_spill] sm:$0xff] %v3697_v13  ;;  %v5101_v17 = vrot.slane %v3691_v7, 7  ;;  %v3706_v22 = vmul.f32 %v3655_v52, %v1188_v5  ;;  %v3711_v23 = vsel %vm1106_vm2, %v1081_v47, %v3693_v8  ;;  %v1287_v24 = vadd.f32 %v1259_v10, %v1199_v6 }
 0x16b   : > { %5192 = vst [vmem:[#allocation32_spill] sm:$0xff] %v3701_v16  ;;  %v2670_v18 = vpop.f32.mrf.mxu0  ;;  %v1417_v20 = vadd.f32 %v1389_v12, %v1345_v11  ;;  %v1140_v25 = vrot.slane %v3691_v7, 1  ;;  %v1187_v27 = vsel %vm1163_vm3, %v1138_v51, %v3697_v13  ;;  %v1261_v35 = vmul.f32 %v3628_v30, %v3691_v7 }
 0x16c   : > { %5193 = vst [vmem:[#allocation33_spill] sm:$0xff] %v3706_v22  ;;  %v1129_v26 = vsel %vm1106_vm2, %v3693_v8, %v5101_v17  ;;  %v3726_v36 = vmul.f32 %v3645_v44, %v3691_v7  ;;  %v1200_v37 = vmul.f32 %v3626_v29, %v3711_v23  ;;  %v3730_v38 = vadd.f32 %v1318_v19, %v1286_v15 }
 0x16d   : > { %v847_v31 = vpop.f32.mrf.mxu0  ;;  %v1477_v33 = vadd.f32 %v1449_v14, %v1417_v20  ;;  %v3734_v39 = vmul.f32 %v3661_v56, %v3691_v7  ;;  %v1201_v40 = vmul.f32 %v3626_v29, %v1129_v26  ;;  %v1509_v41 = vmul.f32 %v3655_v52, %v1187_v27 }
 0x16e   : > { %v1260_v46 = vmul.f32 %v3628_v30, %v828_v59  ;;  %v1319_v47 = vmul.f32 %v3649_v48, %v1187_v27  ;;  %v1709_v51 = vmul.f32 %v3653_v50, %v1129_v26  ;;  %v843_v55 = vadd.f32 %v2667_v0, %v3624_v28 }
 0x16f   : > { %5194 = vst [vmem:[#allocation34_spill] sm:$0xff] %v3734_v39  ;;  %v2673_v43 = vpop.f32.mrf.mxu0  ;;  %v1537_v57 = vadd.f32 %v1509_v41, %v1477_v33  ;;  %v3743_v58 = vadd.f32 %v3624_v28, %v837_v9  ;;  %v853_v61 = vadd.f32 %v2670_v18, %v3624_v28  ;;  %v3747_v62 = vadd.f32 %v3624_v28, %v847_v31 }
 0x170   : > { %v3749_v1 = vadd.f32 %v1260_v46, %v1200_v37  ;;  %v3752_v2 = vmul.f32 %v3651_v49, %v1129_v26  ;;  %v3755_v3 = vmul.f32 %v3645_v44, %v828_v59  ;;  %v3758_v0 = vmul.f32 %v3632_v34, %v843_v55 }
 0x171   : > { %v857_v63 = vpop.f32.mrf.mxu0  ;;  %v1289_v5 = vadd.f32 %v1261_v35, %v1201_v40  ;;  %v3760_v6 = vadd.f32 %v1709_v51, %v1537_v57  ;;  %v5102_v9 = vrot.slane %v3743_v58, 7  ;;  %v5100_v10 = vrot.slane %v3743_v58, 1 }
 0x172   : > { %v3764_v12 = vadd.f32 %v1319_v47, %v1287_v24  ;;  %v3767_v14 = vmul.f32 %v3661_v56, %v828_v59  ;;  %v1085_v15 = vrot.slane %v3758_v0, 7  ;;  %v863_v18 = vadd.f32 %v2673_v43, %v3624_v28 }
 0x173   : > { %5195 = vst [vmem:[#allocation35_spill] sm:$0xff] %v3760_v6  ;;  %v2676_v11 = vpop.f32.mrf.mxu0  ;;  %v3775_v19 = vsel %vm1163_vm3, %v1140_v25, %v5100_v10  ;;  %v3778_v20 = vmul.f32 %v3632_v34, %v853_v61  ;;  %v1086_v26 = vrot.slane %v3747_v62, 7  ;;  %v3782_v24 = vadd.f32 %v3624_v28, %v857_v63 }
 0x174   : > { %5196 = vst [vmem:[#allocation36_spill] sm:$0xff] %v3767_v14  ;;  %v3788_v27 = vsel %vm1106_vm2, %v5102_v9, %v1085_v15  ;;  %v3792_v31 = vmul.f32 %v3628_v30, %v3743_v58  ;;  %v1321_v33 = vmul.f32 %v3649_v48, %v3775_v19  ;;  %v3799_v35 = vsel %vm1163_vm3, %v3697_v13, %v1140_v25 }
 0x175   : > { %v867_v59 = vpop.f32.mrf.mxu0  ;;  %5197 = vst [vmem:[#allocation37_spill] sm:$0xff] %v3799_v35  ;;  %v3803_v37 = vmul.f32 %v3628_v30, %v3758_v0  ;;  %v3807_v40 = vmul.f32 %v3645_v44, %v3758_v0  ;;  %v3811_v41 = vmul.f32 %v3645_v44, %v3743_v58  ;;  %v1087_v43 = vrot.slane %v3778_v20, 7 }
 0x176   : > { %v3816_v47 = vmul.f32 %v3666_v60, %v3775_v19  ;;  %v3820_v25 = vsel %vm1106_vm2, %v1085_v15, %v1086_v26  ;;  %v1264_v55 = vmul.f32 %v3628_v30, %v3747_v62  ;;  %v3827_v57 = vmul.f32 %v3626_v29, %v3788_v27 }
 0x177   : > { %5198 = vst [vmem:[#allocation38_spill] sm:$0xff] %v3807_v40  ;;  %v2679_v46 = vpop.f32.mrf.mxu0  ;;  %v3831_v61 = vmul.f32 %v3651_v49, %v3788_v27  ;;  %v3835_v63 = vsel %vm1106_vm2, %v1086_v26, %v1087_v43  ;;  %v1204_v15 = vmul.f32 %v3626_v29, %v3820_v25  ;;  %v3839_v51 = vadd.f32 %v1321_v33, %v1289_v5 }
 0x178   : > { %5199 = vst [vmem:[#allocation39_spill] sm:$0xff] %v3816_v47  ;;  %5201 = vst [vmem:[#allocation41_spill] sm:$0xff] %v3835_v63  ;;  %v3843_v9 = vmul.f32 %v3632_v34, %v863_v18  ;;  %v1088_v13 = vrot.slane %v3782_v24, 7  ;;  %v3848_v47 = vmul.f32 %v3628_v30, %v3778_v20  ;;  %v3852_v26 = vmul.f32 %v3645_v44, %v3778_v20 }
 0x179   : > { %5200 = vst [vmem:[#allocation40_spill] sm:$0xff] %v3831_v61  ;;  %v877_v10 = vpop.f32.mrf.mxu0  ;;  %v3856_v14 = vmul.f32 %v3645_v44, %v3747_v62  ;;  %v3860_v5 = vmul.f32 %v3661_v56, %v3747_v62  ;;  %v3864_v33 = vmul.f32 %v3626_v29, %v3835_v63  ;;  %v3866_v17 = vadd.f32 %v1264_v55, %v1204_v15 }
 0x17a   : > { %5202 = vst [vmem:[#allocation42_spill] sm:$0xff] %v3843_v9  ;;  %5203 = vst [vmem:[#allocation43_spill] sm:$0xff] %v3848_v47  ;;  %v3870_v39 = vmul.f32 %v3651_v49, %v3835_v63  ;;  %v1089_v6 = vrot.slane %v3843_v9, 7  ;;  %v3875_v8 = vsel %vm1106_vm2, %v1087_v43, %v1088_v13  ;;  %v873_v16 = vadd.f32 %v2676_v11, %v3624_v28 }
 0x17b   : > { %5204 = vst [vmem:[#allocation44_spill] sm:$0xff] %v3852_v26  ;;  %5205 = vst [vmem:[#allocation45_spill] sm:$0xff] %v3856_v14  ;;  %v2682_v18 = vpop.f32.mrf.mxu0  ;;  %v3880_v26 = vadd.f32 %v3624_v28, %v867_v59  ;;  %v1206_v15 = vmul.f32 %v3626_v29, %v3875_v8  ;;  %v883_v43 = vadd.f32 %v2679_v46, %v3624_v28 }
 0x17c   : > { %5206 = vst [vmem:[#allocation46_spill] sm:$0xff] %v3864_v33  ;;  %5207 = vst [vmem:[#allocation47_spill] sm:$0xff] %v3870_v39  ;;  %v3884_v55 = vsel %vm1106_vm2, %v1088_v13, %v1089_v6  ;;  %v1266_v39 = vmul.f32 %v3628_v30, %v3782_v24  ;;  %v3894_v11 = vmul.f32 %v3645_v44, %v3782_v24 }
 0x17d   : > { %5208 = vst [vmem:[#allocation48_spill] sm:$0xff] %v3875_v8  ;;  %5209 = vst [vmem:[#allocation49_spill] sm:$0xff] %v3880_v26  ;;  %v887_v14 = vpop.f32.mrf.mxu0  ;;  %v3897_v59 = vmul.f32 %v3632_v34, %v873_v16  ;;  %v1090_v13 = vrot.slane %v3880_v26, 7  ;;  %v3902_v40 = vmul.f32 %v3628_v30, %v3843_v9  ;;  %v3906_v47 = vmul.f32 %v3645_v44, %v3843_v9 }
 0x17e   : > { %5210 = vst [vmem:[#allocation50_spill] sm:$0xff] %v3884_v55  ;;  %5211 = vst [vmem:[#allocation51_spill] sm:$0xff] %v3894_v11  ;;  %v3910_v46 = vmul.f32 %v3651_v49, %v3875_v8  ;;  %v3914_v22 = vmul.f32 %v3661_v56, %v3782_v24  ;;  %v3918_v16 = vmul.f32 %v3626_v29, %v3884_v55 }
 0x17f   : > { %5212 = vst [vmem:[#allocation52_spill] sm:$0xff] %v3897_v59  ;;  %v2685_v63 = vpop.f32.mrf.mxu0  ;;  %5213 = vst [vmem:[#allocation53_spill] sm:$0xff] %v3902_v40  ;;  %v3920_v11 = vadd.f32 %v1266_v39, %v1206_v15  ;;  %v3924_v40 = vmul.f32 %v3651_v49, %v3884_v55  ;;  %v3967_v8 = vmul.f32 %v3661_v56, %v3880_v26 }
 0x180   : > { %5214 = vst [vmem:[#allocation54_spill] sm:$0xff] %v3906_v47  ;;  %5215 = vst [vmem:[#allocation55_spill] sm:$0xff] %v3910_v46  ;;  %v1091_v47 = vrot.slane %v3897_v59, 7  ;;  %v3929_v46 = vsel %vm1106_vm2, %v1089_v6, %v1090_v13  ;;  %v893_v6 = vadd.f32 %v2682_v18, %v3624_v28 }
 0x181   : > { %5216 = vst [vmem:[#allocation56_spill] sm:$0xff] %v3914_v22  ;;  %5217 = vst [vmem:[#allocation57_spill] sm:$0xff] %v3918_v16  ;;  %v897_v9 = vpop.f32.mrf.mxu0  ;;  %v3933_v22 = vmul.f32 %v3632_v34, %v883_v43  ;;  %v3936_v16 = vadd.f32 %v3624_v28, %v877_v10  ;;  %v1208_v15 = vmul.f32 %v3626_v29, %v3929_v46 }
 0x182   : > { %5218 = vst [vmem:[#allocation58_spill] sm:$0xff] %v3920_v11  ;;  %5219 = vst [vmem:[#allocation59_spill] sm:$0xff] %v3924_v40  ;;  %v3940_v39 = vsel %vm1106_vm2, %v1090_v13, %v1091_v47  ;;  %v1268_v40 = vmul.f32 %v3628_v30, %v3880_v26  ;;  %v3950_v43 = vmul.f32 %v3628_v30, %v3897_v59 }
 0x183   : > { %5220 = vst [vmem:[#allocation60_spill] sm:$0xff] %v3929_v46  ;;  %5221 = vst [vmem:[#allocation61_spill] sm:$0xff] %v3933_v22  ;;  %v2688_v55 = vpop.f32.mrf.mxu0  ;;  %v3954_v10 = vmul.f32 %v3645_v44, %v3880_v26  ;;  %v1093_v13 = vrot.slane %v3933_v22, 7  ;;  %v3959_v11 = vmul.f32 %v3645_v44, %v3897_v59  ;;  %v3963_v18 = vmul.f32 %v3651_v49, %v3929_v46 }
 0x184   : > { %5222 = vst [vmem:[#allocation62_spill] sm:$0xff] %v3936_v16  ;;  %5223 = vst [vmem:[#allocation63_spill] sm:$0xff] %v3940_v39  ;;  %v3974_v61 = vadd.f32 %v1268_v40, %v1208_v15  ;;  %v3990_v59 = vmul.f32 %v3632_v34, %v893_v6  ;;  %v3993_v40 = vadd.f32 %v3624_v28, %v887_v14 }
 0x185   : > { %5224 = vst [vmem:[#allocation64_spill] sm:$0xff] %v3950_v43  ;;  %5225 = vst [vmem:[#allocation65_spill] sm:$0xff] %v3954_v10  ;;  %v1092_v43 = vrot.slane %v3936_v16, 7  ;;  %v907_v33 = vpop.f32.mrf.mxu0  ;;  %v3972_v10 = vmul.f32 %v3626_v29, %v3940_v39  ;;  %v3997_v15 = vmul.f32 %v3628_v30, %v3933_v22  ;;  %v4001_v46 = vmul.f32 %v3645_v44, %v3933_v22 }
 0x186   : > { %5226 = vst [vmem:[#allocation66_spill] sm:$0xff] %v3959_v11  ;;  %5227 = vst [vmem:[#allocation67_spill] sm:$0xff] %v3963_v18  ;;  %v3978_v11 = vmul.f32 %v3651_v49, %v3940_v39  ;;  %v4010_v14 = vmul.f32 %v3645_v44, %v3936_v16  ;;  %v1095_v39 = vrot.slane %v3990_v59, 7 }
 0x187   : > { %5228 = vst [vmem:[#allocation68_spill] sm:$0xff] %v3967_v8  ;;  %5229 = vst [vmem:[#allocation69_spill] sm:$0xff] %v3972_v10  ;;  %v3983_v18 = vsel %vm1106_vm2, %v1092_v43, %v1093_v13  ;;  %v3987_v8 = vsel %vm1106_vm2, %v1091_v47, %v1092_v43  ;;  %v1270_v47 = vmul.f32 %v3628_v30, %v3936_v16  ;;  %v2691_v43 = vpop.f32.mrf.mxu0 }
 0x188   : > { %5230 = vst [vmem:[#allocation70_spill] sm:$0xff] %v3974_v61  ;;  %5231 = vst [vmem:[#allocation71_spill] sm:$0xff] %v3978_v11  ;;  %v1210_v6 = vmul.f32 %v3626_v29, %v3987_v8  ;;  %v4019_v11 = vmul.f32 %v3626_v29, %v3983_v18  ;;  %v4027_v22 = vmul.f32 %v3651_v49, %v3983_v18 }
 0x189   : > { %5232 = vst [vmem:[#allocation72_spill] sm:$0xff] %v3983_v18  ;;  %5233 = vst [vmem:[#allocation73_spill] sm:$0xff] %v3987_v8  ;;  %v903_v61 = vadd.f32 %v2685_v63, %v3624_v28  ;;  %v913_v18 = vadd.f32 %v2688_v55, %v3624_v28 }
 0x18a   : > { %5234 = vst [vmem:[#allocation74_spill] sm:$0xff] %v3990_v59  ;;  %5235 = vst [vmem:[#allocation75_spill] sm:$0xff] %v3993_v40 }
 0x18b   : > { %5236 = vst [vmem:[#allocation76_spill] sm:$0xff] %v3997_v15  ;;  %5237 = vst [vmem:[#allocation77_spill] sm:$0xff] %v4001_v46  ;;  %v4014_v15 = vmul.f32 %v3661_v56, %v3936_v16  ;;  %v4023_v46 = vmul.f32 %v3651_v49, %v3987_v8  ;;  %v4052_v8 = vadd.f32 %v1270_v47, %v1210_v6 }
 0x18c   : > { %5238 = vst [vmem:[#allocation78_spill] sm:$0xff] %v4010_v14  ;;  %5240 = vst [vmem:[#allocation80_spill] sm:$0xff] %v4019_v11  ;;  %v1094_v14 = vrot.slane %v3993_v40, 7  ;;  %v4037_v11 = vadd.f32 %v3624_v28, %v897_v9  ;;  %v4068_v55 = vmul.f32 %v3632_v34, %v903_v61  ;;  %v4080_v9 = vmul.f32 %v3632_v34, %v913_v18 }
 0x18d   : > { %5239 = vst [vmem:[#allocation79_spill] sm:$0xff] %v4014_v15  ;;  %5241 = vst [vmem:[#allocation81_spill] sm:$0xff] %v4023_v46  ;;  %v4033_v15 = vmul.f32 %v3628_v30, %v3990_v59  ;;  %v4041_v46 = vmul.f32 %v3645_v44, %v3990_v59  ;;  %v4061_v59 = vmul.f32 %v3645_v44, %v3993_v40 }
 0x18e   : > { %5242 = vst [vmem:[#allocation82_spill] sm:$0xff] %v4027_v22  ;;  %5244 = vst [vmem:[#allocation84_spill] sm:$0xff] %v4037_v11  ;;  %v4045_v22 = vsel %vm1106_vm2, %v1094_v14, %v1095_v39  ;;  %v4049_v10 = vsel %vm1106_vm2, %v1093_v13, %v1094_v14  ;;  %v4065_v13 = vmul.f32 %v3661_v56, %v3993_v40  ;;  %v1096_v47 = vrot.slane %v4037_v11, 7 }
 0x18f   : > { %5243 = vst [vmem:[#allocation83_spill] sm:$0xff] %v4033_v15  ;;  %5245 = vst [vmem:[#allocation85_spill] sm:$0xff] %v4041_v46  ;;  %v917_v15 = vpop.f32.mrf.mxu0  ;;  %v1212_v63 = vmul.f32 %v3626_v29, %v4049_v10  ;;  %v1272_v46 = vmul.f32 %v3628_v30, %v3993_v40  ;;  %v4073_v6 = vmul.f32 %v3626_v29, %v4045_v22 }
 0x190   : > { %5246 = vst [vmem:[#allocation86_spill] sm:$0xff] %v4045_v22  ;;  %5247 = vst [vmem:[#allocation87_spill] sm:$0xff] %v4049_v10  ;;  %v4077_v14 = vmul.f32 %v3651_v49, %v4049_v10  ;;  %v4087_v61 = vmul.f32 %v3651_v49, %v4045_v22  ;;  %v4097_v18 = vsel %vm1106_vm2, %v1095_v39, %v1096_v47 }
 0x191   : > { %5248 = vst [vmem:[#allocation88_spill] sm:$0xff] %v4052_v8  ;;  %5249 = vst [vmem:[#allocation89_spill] sm:$0xff] %v4061_v59  ;;  %v4083_v59 = vadd.f32 %v3624_v28, %v907_v33  ;;  %v2694_v40 = vpop.f32.mrf.mxu0  ;;  %v4093_v10 = vadd.f32 %v1272_v46, %v1212_v63  ;;  %v4101_v33 = vmul.f32 %v3645_v44, %v4037_v11 }
 0x192   : > { %5250 = vst [vmem:[#allocation90_spill] sm:$0xff] %v4065_v13  ;;  %5251 = vst [vmem:[#allocation91_spill] sm:$0xff] %v4068_v55  ;;  %v1097_v13 = vrot.slane %v4068_v55, 7  ;;  %v1214_v46 = vmul.f32 %v3626_v29, %v4097_v18  ;;  %v4113_v63 = vmul.f32 %v3661_v56, %v4037_v11  ;;  %v4117_v39 = vmul.f32 %v3628_v30, %v4068_v55 }
 0x193   : > { %5252 = vst [vmem:[#allocation92_spill] sm:$0xff] %v4073_v6  ;;  %5253 = vst [vmem:[#allocation93_spill] sm:$0xff] %v4077_v14  ;;  %v1274_v6 = vmul.f32 %v3628_v30, %v4037_v11 }
 0x194   : > { %5254 = vst [vmem:[#allocation94_spill] sm:$0xff] %v4080_v9  ;;  %5255 = vst [vmem:[#allocation95_spill] sm:$0xff] %v4083_v59  ;;  %v4107_v8 = vsel %vm1106_vm2, %v1096_v47, %v1097_v13  ;;  %v1098_v47 = vrot.slane %v4083_v59, 7 }
 0x195   : > { %5256 = vst [vmem:[#allocation96_spill] sm:$0xff] %v4087_v61  ;;  %5257 = vst [vmem:[#allocation97_spill] sm:$0xff] %v4093_v10  ;;  %v1099_v61 = vrot.slane %v4080_v9, 7  ;;  %v4127_v22 = vmul.f32 %v3626_v29, %v4107_v8  ;;  %v4131_v10 = vmul.f32 %v3651_v49, %v4097_v18 }
 0x196   : > { %5258 = vst [vmem:[#allocation98_spill] sm:$0xff] %v4097_v18  ;;  %5259 = vst [vmem:[#allocation99_spill] sm:$0xff] %v4101_v33  ;;  %v4121_v33 = vmul.f32 %v3645_v44, %v4068_v55  ;;  %v923_v18 = vadd.f32 %v2691_v43, %v3624_v28  ;;  %v4153_v55 = vadd.f32 %v1274_v6, %v1214_v46 }
 0x197   : > { %5260 = vst [vmem:[#allocation100_spill] sm:$0xff] %v4107_v8  ;;  %5261 = vst [vmem:[#allocation101_spill] sm:$0xff] %v4113_v63  ;;  %v4135_v63 = vmul.f32 %v3628_v30, %v4080_v9  ;;  %v4143_v14 = vsel %vm1106_vm2, %v1098_v47, %v1099_v61  ;;  %v4166_v43 = vmul.f32 %v3645_v44, %v4083_v59 }
 0x198   : > { %5262 = vst [vmem:[#allocation102_spill] sm:$0xff] %v4117_v39  ;;  %5263 = vst [vmem:[#allocation103_spill] sm:$0xff] %v4121_v33  ;;  %v4139_v39 = vmul.f32 %v3645_v44, %v4080_v9  ;;  %v927_v33 = vpop.f32.mrf.mxu0  ;;  %v4174_v46 = vmul.f32 %v3626_v29, %v4143_v14 }
 0x199   : > { %5264 = vst [vmem:[#allocation104_spill] sm:$0xff] %v4127_v22  ;;  %5265 = vst [vmem:[#allocation105_spill] sm:$0xff] %v4131_v10  ;;  %v4147_v22 = vsel %vm1106_vm2, %v1097_v13, %v1098_v47  ;;  %v4151_v10 = vadd.f32 %v3624_v28, %v917_v15  ;;  %v1276_v13 = vmul.f32 %v3628_v30, %v4083_v59 }
 0x19a   : > { %5266 = vst [vmem:[#allocation106_spill] sm:$0xff] %v4135_v63  ;;  %5267 = vst [vmem:[#allocation107_spill] sm:$0xff] %v4139_v39  ;;  %v4157_v63 = vmul.f32 %v3651_v49, %v4107_v8  ;;  %v1216_v9 = vmul.f32 %v3626_v29, %v4147_v22  ;;  %v4169_v15 = vmul.f32 %v3632_v34, %v923_v18 }
 0x19b   : > { %5268 = vst [vmem:[#allocation108_spill] sm:$0xff] %v4143_v14  ;;  %5269 = vst [vmem:[#allocation109_spill] sm:$0xff] %v4147_v22  ;;  %v1100_v6 = vrot.slane %v4151_v10, 7  ;;  %v4178_v47 = vmul.f32 %v3651_v49, %v4147_v22  ;;  %v4182_v39 = vmul.f32 %v3661_v56, %v4083_v59  ;;  %v4187_v18 = vmul.f32 %v3651_v49, %v4143_v14 }
 0x19c   : > { %5270 = vst [vmem:[#allocation110_spill] sm:$0xff] %v4151_v10  ;;  %5271 = vst [vmem:[#allocation111_spill] sm:$0xff] %v4153_v55  ;;  %v1101_v8 = vrot.slane %v4169_v15, 7  ;;  %v4193_v22 = vadd.f32 %v1276_v13, %v1216_v9  ;;  %v4211_v55 = vmul.f32 %v3645_v44, %v4151_v10  ;;  %v4215_v9 = vmul.f32 %v3661_v56, %v4151_v10 }
 0x19d   : > { %5272 = vst [vmem:[#allocation112_spill] sm:$0xff] %v4157_v63  ;;  %5273 = vst [vmem:[#allocation113_spill] sm:$0xff] %v4166_v43  ;;  %v933_v63 = vadd.f32 %v2694_v40, %v3624_v28  ;;  %v2697_v43 = vpop.f32.mrf.mxu0 }
 0x19e   : > { %5274 = vst [vmem:[#allocation114_spill] sm:$0xff] %v4169_v15  ;;  %5275 = vst [vmem:[#allocation115_spill] sm:$0xff] %v4174_v46  ;;  %v1278_v46 = vmul.f32 %v3628_v30, %v4151_v10 }
 0x19f   : > { %5276 = vst [vmem:[#allocation116_spill] sm:$0xff] %v4178_v47  ;;  %5277 = vst [vmem:[#allocation117_spill] sm:$0xff] %v4182_v39  ;;  %v4197_v47 = vsel %vm1106_vm2, %v1099_v61, %v1100_v6  ;;  %v4200_v40 = vmul.f32 %v3632_v34, %v933_v63  ;;  %v4203_v39 = vadd.f32 %v3624_v28, %v927_v33  ;;  %v937_v59 = vpop.f32.mrf.mxu0 }
 0x1a0   : > { %5278 = vst [vmem:[#allocation118_spill] sm:$0xff] %v4187_v18  ;;  %5279 = vst [vmem:[#allocation119_spill] sm:$0xff] %v4193_v22  ;;  %v4207_v18 = vsel %vm1106_vm2, %v1100_v6, %v1101_v8  ;;  %v943_v61 = vadd.f32 %v2697_v43, %v3624_v28  ;;  %v4221_v33 = vmul.f32 %v3628_v30, %v4169_v15  ;;  %v1142_v6 = vrot.slane %v3758_v0, 1 }
 0x1a1   : > { %5280 = vst [vmem:[#allocation120_spill] sm:$0xff] %v4197_v47  ;;  %5281 = vst [vmem:[#allocation121_spill] sm:$0xff] %v4203_v39  ;;  %v1218_v13 = vmul.f32 %v3626_v29, %v4197_v47  ;;  %v1102_v63 = vrot.slane %v4203_v39, 7  ;;  %v4242_v14 = vmul.f32 %v3651_v49, %v4207_v18  ;;  %v5292_v43 = vrot.slane %v4200_v40, 7 }
 0x1a2   : > { %5282 = vst [vmem:[#allocation122_spill] sm:$0xff] %v4207_v18  ;;  %5283 = vst [vmem:[#allocation123_spill] sm:$0xff] %v4211_v55  ;;  %v4228_v55 = vmul.f32 %v3645_v44, %v4169_v15  ;;  %v5291_v15 = vrot.slane %v3691_v7, 7  ;;  %v4269_v7 = vmul.f32 %v3628_v30, %v4200_v40  ;;  %v4353_v16 = vadd.f32 %v3624_v28, %v937_v59 }
 0x1a3   : > { %5284 = vst [vmem:[#allocation124_spill] sm:$0xff] %v4215_v9  ;;  %5285 = vst [vmem:[#allocation125_spill] sm:$0xff] %v4221_v33  ;;  %v4232_v9 = vmul.f32 %v3651_v49, %v4197_v47  ;;  %v4238_v33 = vmul.f32 %v3626_v29, %v4207_v18  ;;  %v4255_v47 = vsel %vm1106_vm2, %v1102_v63, %v5292_v43 }
 0x1a4   : > { %5286 = vst [vmem:[#allocation126_spill] sm:$0xff] %v4228_v55  ;;  %5289 = vst [vmem:[#allocation129_spill] sm:$0xff] %v4242_v14  ;;  %v5290_v55 = vrot.slane %v3743_v58, 7  ;;  %v4262_v14 = vmul.f32 %v3632_v34, %v943_v61  ;;  %v4265_v18 = vadd.f32 %v1278_v46, %v1218_v13  ;;  %v5300_v61 = vrot.slane %v4203_v39, 1 }
 0x1a5   : > { %5287 = vst [vmem:[#allocation127_spill] sm:$0xff] %v4232_v9  ;;  %5288 = vst [vmem:[#allocation128_spill] sm:$0xff] %v4238_v33  ;;  %v4259_v33 = vsel %vm1106_vm2, %v1101_v8, %v1102_v63  ;;  %v5299_v8 = vrot.slane %v4200_v40, 1  ;;  %v1280_v46 = vmul.f32 %v3628_v30, %v4203_v39  ;;  %v4289_v13 = vmul.f32 %v3645_v44, %v4203_v39 }
 0x1a6   : > { %v1128_v9 = vsel %vm1106_vm2, %v5291_v15, %v5290_v55  ;;  %5293 = vst [vmem:[#allocation130_spill] sm:$0xff] %v4255_v47  ;;  %5294 = vst [vmem:[#allocation131_spill] sm:$0xff] %v4259_v33  ;;  %v4273_v55 = vmul.f32 %v3645_v44, %v4200_v40  ;;  %v1220_v15 = vmul.f32 %v3626_v29, %v4259_v33 }
 0x1a7   : > { %5295 = vst [vmem:[#allocation132_spill] sm:$0xff] %v4262_v14  ;;  %5296 = vst [vmem:[#allocation133_spill] sm:$0xff] %v4265_v18  ;;  %v4283_v63 = vsel %vm1163_vm3, %v5300_v61, %v5299_v8  ;;  %v4293_v43 = vmul.f32 %v3661_v56, %v4203_v39  ;;  %v4304_v8 = vrot.slane %v4262_v14, 7  ;;  %v4307_v61 = vrot.slane %v4262_v14, 1 }
 0x1a8   : > { %5297 = vst [vmem:[#allocation134_spill] sm:$0xff] %v4269_v7  ;;  %5298 = vst [vmem:[#allocation135_spill] sm:$0xff] %v4273_v55  ;;  %v4297_v55 = vmul.f32 %v3626_v29, %v4255_v47  ;;  %v4301_v7 = vmul.f32 %v3651_v49, %v4259_v33  ;;  %v1308_v18 = vadd.f32 %v1280_v46, %v1220_v15 }
 0x1a9   : > { %5301 = vst [vmem:[#allocation136_spill] sm:$0xff] %v4283_v63  ;;  %5302 = vst [vmem:[#allocation137_spill] sm:$0xff] %v4289_v13  ;;  %v5306_v13 = vrot.slane %v3743_v58, 1  ;;  %v1202_v39 = vmul.f32 %v3626_v29, %v1128_v9  ;;  %v4320_v33 = vmul.f32 %v3651_v49, %v4255_v47  ;;  %v4324_v15 = vmul.f32 %v3628_v30, %v4262_v14 }
 0x1aa   : > { %5303 = vst [vmem:[#allocation138_spill] sm:$0xff] %v4293_v43  ;;  %5304 = vst [vmem:[#allocation139_spill] sm:$0xff] %v4297_v55  ;;  %v1320_v55 = vmul.f32 %v3649_v48, %v3799_v35  ;;  %v1390_v46 = vmul.f32 %v3651_v49, %v3711_v23  ;;  %v4343_v23 = vsel %vm1163_vm3, %v4307_v61, %v3647_v45  ;;  %v5309_v45 = vrot.slane %v3747_v62, 1 }
 0x1ab   : > { %5305 = vst [vmem:[#allocation140_spill] sm:$0xff] %v4301_v7  ;;  %v1184_v43 = vsel %vm1163_vm3, %v5306_v13, %v1142_v6  ;;  %v1340_v7 = vmul.f32 %v3649_v48, %v4283_v63  ;;  %5307 = vst [vmem:[#allocation141_spill] sm:$0xff] %v4320_v33  ;;  %v4330_v13 = vmul.f32 %v3645_v44, %v4262_v14 }
 0x1ac   : > { %v1290_v22 = vadd.f32 %v3792_v31, %v1202_v39  ;;  %v1348_v10 = vadd.f32 %v1320_v55, %v3749_v1  ;;  %v1392_v63 = vmul.f32 %v3651_v49, %v1128_v9  ;;  %v1134_v33 = vsel %vm1106_vm2, %v4304_v8, %v3630_v32 }
 0x1ad   : > { %5308 = vst [vmem:[#allocation142_spill] sm:$0xff] %v4330_v13  ;;  %v1322_v13 = vmul.f32 %v3649_v48, %v1184_v43  ;;  %v1418_v31 = vadd.f32 %v1390_v46, %v3730_v38  ;;  %v1368_v39 = vadd.f32 %v1340_v7, %v1308_v18  ;;  %v1394_v1 = vmul.f32 %v3651_v49, %v3820_v25 }
 0x1ae   : > { %v1420_v55 = vadd.f32 %v1392_v63, %v1348_v10  ;;  %v1510_v14 = vmul.f32 %v3655_v52, %v3799_v35  ;;  %v1183_v26 = vsel %vm1163_vm3, %v1142_v6, %v5309_v45  ;;  %v1196_v38 = vmul.f32 %v3626_v29, %v1134_v33  ;;  %v2700_v6 = vpop.f32.mrf.mxu0 }
 0x1af   : > { %v1350_v47 = vadd.f32 %v1322_v13, %v1290_v22  ;;  %v1478_v11 = vadd.f32 %v3755_v3, %v1418_v31  ;;  %v1512_v10 = vmul.f32 %v3655_v52, %v1184_v43  ;;  %v1710_v7 = vmul.f32 %v3653_v50, %v1128_v9 }
 0x1b0   : > { %v1480_v18 = vadd.f32 %v3811_v41, %v1420_v55  ;;  %v1770_v22 = vmul.f32 %v3661_v56, %v3743_v58  ;;  %v1104_v3 = vrot.slane %v4353_v16, 7  ;;  %v1419_v59 = vadd.f32 %v3752_v2, %v3764_v12  ;;  %v594_v55 = vld [vmem:[%s3518_s16] sm:$0xff] }
 0x1b1   : > { %v1538_v63 = vadd.f32 %v1510_v14, %v1478_v11  ;;  %v1830_v46 = vmul.f32 %v3666_v60, %v1184_v43  ;;  %v5155_v45 = vrot.slane %v4353_v16, 1  ;;  %v1291_v41 = vadd.f32 %v3803_v37, %v3827_v57  ;;  %596 = vst.msk [vmem:[#allocation2 + $0xf0] sm:$0xff] %vm535_vm0, %v594_v55  ;;  %v947_v55 = vpop.f32.mrf.mxu0 }
 0x1b2   : > { %v1323_v33 = vmul.f32 %v3649_v48, %v1183_v26  ;;  %v4373_v9 = vadd.f32 %v1394_v1, %v1350_v47  ;;  %v4378_v58 = vsel %vm1106_vm2, %v1104_v3, %v4304_v8  ;;  %v5310_v2 = vrot.slane %v4200_v40, 7 }
 0x1b3   : > { %v1738_v11 = vadd.f32 %v1710_v7, %v1538_v63  ;;  %v1540_v14 = vadd.f32 %v1512_v10, %v1480_v18  ;;  %v1282_v37 = vmul.f32 %v3628_v30, %v4353_v16  ;;  %v1472_v47 = vmul.f32 %v3645_v44, %v4353_v16 }
 0x1b4   : > { %v4384_v12 = vsel %vm1106_vm2, %v5310_v2, %v1104_v3  ;;  %v4394_v13 = vmul.f32 %v3661_v56, %v4353_v16  ;;  %v1479_v31 = vadd.f32 %v3726_v36, %v1419_v59  ;;  %v1511_v1 = vmul.f32 %v3655_v52, %v3775_v19  ;;  %v595_v36 = vld [vmem:[%s3518_s16 + $0x8] sm:$0xff]  ;;  %v4422_v59 = vld [vmem:[%s5083_s6] ss:$0 sm:$0xff]  ;;  %s3150_s16 = sshll.u32 %s3251_s20, 4  ;;  %s3151_s16 = int_to_ptr.vmem [resolvable:$false] %s3150_s16 }
 0x1b5   : > { %v1412_v57 = vmul.f32 %v3651_v49, %v4384_v12  ;;  %v1798_v43 = vadd.f32 %v1770_v22, %v1738_v11  ;;  %v4405_v30 = vsel %vm1163_vm3, %v5155_v45, %v4307_v61  ;;  %v1222_v18 = vmul.f32 %v3626_v29, %v4384_v12  ;;  %597 = vst.msk [vmem:[#allocation2 + $0xf8] sm:$0xff] %vm535_vm0, %v595_v36  ;;  %v5333_v45 = vld [vmem:[#allocation57_spill] sm:$0xff]  ;;  %s3152_s15 = scalar_lea.vmem %s3151_s16, 7168  ;;  %p3153_p0 = scmp.lt.s32.totalorder %s5028_s27, %s3151_s16 }
 0x1b6   : > { %v1223_v10 = vmul.f32 %v3626_v29, %v4378_v58  ;;  %v4411_v7 = vadd.f32 %v1323_v33, %v1291_v41  ;;  %v1539_v63 = vadd.f32 %v1511_v1, %v1479_v31  ;;  %v1711_v22 = vmul.f32 %v3653_v50, %v3788_v27  ;;  %p3154_p6 = scmp.lt.s32.totalorder %s3152_s15, %s3146_s28 }
 0x1b7   : > { %v1858_v19 = vadd.f32 %v1830_v46, %v1798_v43  ;;  %v953_v3 = vadd.f32 %v2700_v6, %v3624_v28  ;;  %v1440_v29 = vadd.f32 %v1412_v57, %v1368_v39  ;;  %v1771_v41 = vmul.f32 %v3661_v56, %v3758_v0 }
 0x1b8   : > { %v1284_v33 = vadd.f32 %v3641_v42, %v1196_v38  ;;  %v1712_v46 = vmul.f32 %v3653_v50, %v3820_v25  ;;  %v1739_v11 = vadd.f32 %v1711_v22, %v1539_v63  ;;  %v5311_v6 = vrot.slane %v3778_v20, 1  ;;  %v628_v22 = vld [vmem:[#allocation2 + $0xf0] sm:$0xff]  ;;  %p3155_p1 = por %p3154_p6, %p3153_p0 }
 0x1b9   : > { %v1893_v27 = vadd.f32 %v4422_v59, %v1858_v19  ;;  %v1004_v2 = vmul.f32 %v3632_v34, %v953_v3  ;;  %v5312_v43 = vrot.slane %v3747_v62, 1  ;;  %v1310_v57 = vadd.f32 %v1282_v37, %v1222_v18  ;;  %2701 = vmatprep.mubr.msk.f32.mxu0 %vm535_vm0, %v628_v22 }
 0x1ba   : > { %v4439_v0 = vmul.f32 %v3651_v49, %v4378_v58  ;;  %v4442_v42 = vmul.f32 %v3655_v52, %v1183_v26  ;;  %v1740_v25 = vadd.f32 %v1712_v46, %v1540_v14  ;;  %v1799_v31 = vadd.f32 %v1771_v41, %v1739_v11  ;;  %p3156_p4 = pnand %p3155_p1, %p3149_p3 }
 0x1bb   : > { %v1182_v39 = vsel %vm1163_vm3, %v5312_v43, %v5311_v6  ;;  %v1949_v38 = vmul.f32 0.70710677, %v1893_v27  ;;  %v1831_v34 = vmul.f32 %v3666_v60, %v1183_v26  ;;  %v1375_v1 = vrot.slane %v1004_v2, 7 }
 0x1bc   : > { %v1500_v36 = vadd.f32 %v1472_v47, %v1440_v29  ;;  %v1344_v62 = vadd.f32 %v3684_v4, %v1284_v33  ;;  %v1324_v19 = vmul.f32 %v3649_v48, %v1182_v39  ;;  %v4448_v37 = vmul.f32 %v3655_v52, %v1182_v39  ;;  %v629_v29 = vld [vmem:[#allocation2 + $0xf8] sm:$0xff] }
 0x1bd   : > { %2927 = verf.f32 %v1949_v38  ;;  %v1859_v18 = vadd.f32 %v1831_v34, %v1799_v31  ;;  %v1378_v14 = vsel %vm1106_vm2, %v1375_v1, %v3657_v53  ;;  %v1832_v63 = vmul.f32 %v3666_v60, %v1182_v39  ;;  %2702 = vmatmul.mubr.msk.f32.gmra.mxu0 %vm535_vm0, %v629_v29 }
 0x1be   : > { %v4454_v26 = vmul.f32 0.5, %v1893_v27  ;;  %v4456_v3 = vrot.slane %v1004_v2, 1  ;;  %v1800_v4 = vadd.f32 %v3860_v5, %v1740_v25  ;;  %v4460_v47 = vadd.f32 %v3624_v28, %v947_v55 }
 0x1bf   : > { %v1894_v41 = vadd.f32 %v4422_v59, %v1859_v18  ;;  %v4465_v33 = vmul.f32 %v3645_v44, %v1004_v2  ;;  %v1311_v53 = vadd.f32 %v4324_v15, %v1223_v10  ;;  %v1342_v46 = vmul.f32 %v3649_v48, %v4405_v30 }
 0x1c0   : > { %v1388_v5 = vmul.f32 %v3651_v49, %v1378_v14  ;;  %v4473_v28 = vmul.f32 %v3661_v56, %v1004_v2  ;;  %v1860_v27 = vadd.f32 %v1832_v63, %v1800_v4  ;;  %v1374_v11 = vrot.slane %v4460_v47, 7 }
 0x1c1   : > { %5313 = vst [vmem:[#allocation143_spill] sm:$0xff] %v4465_v33  ;;  %v1950_v6 = vmul.f32 0.70710677, %v1894_v41  ;;  %v1343_v43 = vmul.f32 %v3649_v48, %v4343_v23  ;;  %v1370_v39 = vadd.f32 %v1342_v46, %v1310_v57  ;;  %v5154_v15 = vrot.slane %v4460_v47, 1 }
 0x1c2   : > { %v4480_v10 = vadd.f32 %v1324_v19, %v3866_v17  ;;  %v1895_v25 = vadd.f32 %v4422_v59, %v1860_v27  ;;  %v1376_v38 = vsel %vm1106_vm2, %v1374_v11, %v1375_v1  ;;  %v1377_v2 = vsel %vm1106_vm2, %v4304_v8, %v1374_v11 }
 0x1c3   : > { %2929 = verf.f32 %v1950_v6  ;;  %v1371_v31 = vadd.f32 %v1343_v43, %v1311_v53  ;;  %v1414_v34 = vmul.f32 %v3651_v49, %v1377_v2  ;;  %v1415_v23 = vmul.f32 %v3651_v49, %v1376_v38  ;;  %v5318_v53 = vld [vmem:[#allocation40_spill] sm:$0xff]  ;;  %v5319_v6 = vld [vmem:[#allocation46_spill] sm:$0xff]  ;;  %v5320_v43 = vld [vmem:[#allocation43_spill] sm:$0xff] }
 0x1c4   : > { %v4494_v17 = vsel %vm1163_vm3, %v4456_v3, %v3659_v54  ;;  %v4499_v57 = vsel %vm1106_vm2, %v1375_v1, %v3630_v32  ;;  %v1951_v55 = vmul.f32 0.70710677, %v1895_v25  ;;  %v1532_v8 = vmul.f32 %v3655_v52, %v4405_v30 }
 0x1c5   : > { %5314 = vst [vmem:[#allocation144_spill] sm:$0xff] %v4499_v57  ;;  %v1922_v19 = vmul.f32 0.5, %v1894_v41  ;;  %v4503_v18 = vadd.f32 %v1388_v5, %v1344_v62  ;;  %v4510_v49 = vsel %vm1163_vm3, %v5154_v15, %v4456_v3  ;;  %v1442_v54 = vadd.f32 %v1414_v34, %v1370_v39  ;;  %v5406_v57 = vld [vmem:[#allocation99_spill] sm:$0xff] }
 0x1c6   : > { %v4512_v14 = vmul.f32 0.5, %v1895_v25  ;;  %2931 = verf.f32 %v1951_v55  ;;  %v1560_v1 = vadd.f32 %v1532_v8, %v1500_v36  ;;  %v1732_v63 = vmul.f32 %v3653_v50, %v1377_v2  ;;  %v5321_v2 = vld [vmem:[#allocation38_spill] sm:$0xff] }
 0x1c7   : > { %v4515_v22 = vadd.f32 %v1415_v23, %v1371_v31  ;;  %v1474_v62 = vmul.f32 %v3645_v44, %v4460_v47  ;;  %v5316_v4 = vrot.slane %v3782_v24, 1  ;;  %v5317_v29 = vrot.slane %v3778_v20, 1  ;;  %v5322_v23 = vld [vmem:[#allocation41_spill] sm:$0xff]  ;;  %v5323_v55 = vld [vmem:[#allocation42_spill] sm:$0xff] }
 0x1c8   : > { %v1421_v46 = vadd.f32 %v5318_v53, %v3839_v51  ;;  %v4529_v36 = vmul.f32 %v3655_v52, %v4510_v49  ;;  %v4532_v5 = vmul.f32 %v3653_v50, %v1376_v38  ;;  %v1760_v27 = vadd.f32 %v1732_v63, %v1560_v1  ;;  %v5326_v63 = vld [vmem:[#allocation45_spill] sm:$0xff] }
 0x1c9   : > { %5315 = vst [vmem:[#allocation145_spill] sm:$0xff] %v4515_v22  ;;  %v1181_v41 = vsel %vm1163_vm3, %v5317_v29, %v5316_v4  ;;  %v1792_v44 = vmul.f32 %v3661_v56, %v4460_v47  ;;  %v4536_v11 = vadd.f32 %v1474_v62, %v1442_v54  ;;  %v1293_v39 = vadd.f32 %v5320_v43, %v5319_v6  ;;  %v5368_v22 = vld [vmem:[#allocation74_spill] sm:$0xff] }
 0x1ca   : > { %v1325_v25 = vmul.f32 %v3649_v48, %v1181_v41  ;;  %v1481_v51 = vadd.f32 %v5321_v2, %v1421_v46  ;;  %v2928_v31 = vpop.eup %2927  ;;  %v1515_v34 = vmul.f32 %v3655_v52, %v1181_v41  ;;  %v1713_v38 = vmul.f32 %v3653_v50, %v5322_v23  ;;  %v5327_v2 = vld [vmem:[#allocation48_spill] sm:$0xff]  ;;  %v5328_v23 = vld [vmem:[#allocation49_spill] sm:$0xff] }
 0x1cb   : > { %v5324_v8 = vrot.slane %v5323_v55, 1  ;;  %v5325_v1 = vmov %v5316_v4  ;;  %v1482_v62 = vadd.f32 %v5326_v63, %v4373_v9  ;;  %v2005_v4 = vadd.f32 1.0, %v2928_v31  ;;  %v5331_v31 = vld [vmem:[#allocation47_spill] sm:$0xff] }
 0x1cc   : > { %v1541_v29 = vadd.f32 %v4442_v42, %v1481_v51  ;;  %v1773_v53 = vmul.f32 %v3661_v56, %v3778_v20  ;;  %v1833_v46 = vmul.f32 %v3666_v60, %v1181_v41  ;;  %v4557_v6 = vadd.f32 %v1792_v44, %v1760_v27 }
 0x1cd   : > { %v1180_v54 = vsel %vm1163_vm3, %v5325_v1, %v5324_v8  ;;  %v1542_v43 = vadd.f32 %v4448_v37, %v1482_v62  ;;  %v1714_v24 = vmul.f32 %v3653_v50, %v5327_v2  ;;  %v5329_v8 = vrot.slane %v5328_v23, 1  ;;  %v5332_v2 = vld [vmem:[#allocation58_spill] sm:$0xff] }
 0x1ce   : > { %v5330_v1 = vrot.slane %v5323_v55, 1  ;;  %v2033_v42 = vmul.f32 %v2005_v4, %v4454_v26  ;;  %v1353_v51 = vadd.f32 %v1325_v25, %v1293_v39  ;;  %v1741_v20 = vadd.f32 %v1713_v38, %v1541_v29  ;;  %v5335_v25 = vld [vmem:[#allocation56_spill] sm:$0xff] }
 0x1cf   : > { %v1326_v41 = vmul.f32 %v3649_v48, %v1180_v54  ;;  %v1516_v27 = vmul.f32 %v3655_v52, %v1180_v54  ;;  %v1742_v44 = vadd.f32 %v1714_v24, %v1542_v43  ;;  %v1834_v37 = vmul.f32 %v3666_v60, %v1180_v54  ;;  %v5336_v4 = vld [vmem:[#allocation44_spill] sm:$0xff]  ;;  %v5337_v54 = vld [vmem:[#allocation50_spill] sm:$0xff] }
 0x1d0   : > { %v1179_v9 = vsel %vm1163_vm3, %v5330_v1, %v5329_v8  ;;  %v1423_v63 = vadd.f32 %v5331_v31, %v4411_v7  ;;  %2739 = vmatprep.mubr.f32.mxu1 %v2033_v42  ;;  %v1801_v62 = vadd.f32 %v1773_v53, %v1741_v20  ;;  %v5334_v8 = vld [vmem:[#allocation53_spill] sm:$0xff]  ;;  %v2930_v39 = vpop.eup %2929  ;;  %v1715_v24 = vmul.f32 %v3653_v50, %v5337_v54  ;;  %v5338_v53 = vld [vmem:[#allocation52_spill] sm:$0xff]  ;;  %v5341_v31 = vld [vmem:[#allocation55_spill] sm:$0xff] }
 0x1d1   : > { %v1354_v15 = vadd.f32 %v1326_v41, %v5332_v2  ;;  %v1295_v1 = vadd.f32 %v5334_v8, %v5333_v45  ;;  %v1327_v26 = vmul.f32 %v3649_v48, %v1179_v9  ;;  %v1802_v38 = vadd.f32 %v5335_v25, %v1742_v44  ;;  %v5342_v54 = vld [vmem:[#allocation51_spill] sm:$0xff] }
 0x1d2   : > { %v1483_v29 = vadd.f32 %v5336_v4, %v1423_v63  ;;  %v1517_v43 = vmul.f32 %v3655_v52, %v1179_v9  ;;  %v2006_v7 = vadd.f32 1.0, %v2930_v39  ;;  %v1861_v42 = vadd.f32 %v1833_v46, %v1801_v62 }
 0x1d3   : > { %v5339_v20 = vrot.slane %v5338_v53, 1  ;;  %v5340_v41 = vrot.slane %v5328_v23, 1  ;;  %v1424_v2 = vadd.f32 %v5341_v31, %v4480_v10  ;;  %v1862_v44 = vadd.f32 %v1834_v37, %v1802_v38  ;;  %v2932_v4 = vpop.eup %2931  ;;  %v5343_v38 = vld [vmem:[#allocation60_spill] sm:$0xff]  ;;  %v5347_v31 = vld [vmem:[#allocation70_spill] sm:$0xff] }
 0x1d4   : > { %v1543_v8 = vadd.f32 %v1515_v34, %v1483_v29  ;;  %v1775_v63 = vmul.f32 %v3661_v56, %v5323_v55  ;;  %v1835_v25 = vmul.f32 %v3666_v60, %v1179_v9  ;;  %v2034_v39 = vmul.f32 %v2006_v7, %v1922_v19  ;;  %v5344_v9 = vld [vmem:[#allocation62_spill] sm:$0xff] }
 0x1d5   : > { %v1178_v45 = vsel %vm1163_vm3, %v5340_v41, %v5339_v20  ;;  %v1896_v46 = vadd.f32 %v4422_v59, %v1861_v42  ;;  %v1355_v62 = vadd.f32 %v1327_v26, %v1295_v1  ;;  %v1484_v23 = vadd.f32 %v5342_v54, %v1424_v2 }
 0x1d6   : > { %v2007_v35 = vadd.f32 1.0, %v2932_v4  ;;  %v1897_v20 = vadd.f32 %v4422_v59, %v1862_v44  ;;  %v1743_v41 = vadd.f32 %v1715_v24, %v1543_v8  ;;  %v1328_v10 = vmul.f32 %v3649_v48, %v1178_v45  ;;  %2740 = vmatmul.mubr.f32.vlgmr.msra.gmra.mxu1 %v2034_v39  ;;  %v5348_v39 = vld [vmem:[#allocation59_spill] sm:$0xff] }
 0x1d7   : > { %v1952_v34 = vmul.f32 0.70710677, %v1896_v46  ;;  %v1544_v37 = vadd.f32 %v1516_v27, %v1484_v23  ;;  %v1716_v55 = vmul.f32 %v3653_v50, %v5343_v38  ;;  %v5345_v29 = vrot.slane %v5344_v9, 1 }
 0x1d8   : > { %v5346_v19 = vrot.slane %v5338_v53, 1  ;;  %v2035_v26 = vmul.f32 %v2007_v35, %v4512_v14  ;;  %v1953_v7 = vmul.f32 0.70710677, %v1897_v20  ;;  %v1803_v42 = vadd.f32 %v1775_v63, %v1743_v41  ;;  %v5349_v35 = vld [vmem:[#allocation68_spill] sm:$0xff]  ;;  %v5350_v63 = vld [vmem:[#allocation69_spill] sm:$0xff] }
 0x1d9   : > { %v1518_v24 = vmul.f32 %v3655_v52, %v1178_v45  ;;  %2933 = verf.f32 %v1952_v34  ;;  %v1356_v2 = vadd.f32 %v1328_v10, %v5347_v31  ;;  %v1744_v27 = vadd.f32 %v1716_v55, %v1544_v37  ;;  %v5351_v41 = vld [vmem:[#allocation64_spill] sm:$0xff]  ;;  %v5352_v10 = vld [vmem:[#allocation54_spill] sm:$0xff] }
 0x1da   : > { %v1177_v1 = vsel %vm1163_vm3, %v5346_v19, %v5345_v29  ;;  %2742 = vmatprep.mubr.f32.mxu1 %v2035_v26  ;;  %2935 = verf.f32 %v1953_v7  ;;  %v1863_v8 = vadd.f32 %v1835_v25, %v1803_v42  ;;  %v1836_v4 = vmul.f32 %v3666_v60, %v1178_v45  ;;  %v5353_v19 = vld [vmem:[#allocation61_spill] sm:$0xff]  ;;  %v5357_v42 = vld [vmem:[#allocation67_spill] sm:$0xff] }
 0x1db   : > { %v1329_v44 = vmul.f32 %v3649_v48, %v1177_v1  ;;  %v1425_v54 = vadd.f32 %v5348_v39, %v1353_v51  ;;  %v1924_v23 = vmul.f32 0.5, %v1896_v46  ;;  %v1925_v38 = vmul.f32 0.5, %v1897_v20  ;;  %v5356_v20 = vld [vmem:[#allocation63_spill] sm:$0xff] }
 0x1dc   : > { %v1804_v14 = vadd.f32 %v5349_v35, %v1744_v27  ;;  %v1297_v29 = vadd.f32 %v5351_v41, %v5350_v63  ;;  %v1898_v34 = vadd.f32 %v4422_v59, %v1863_v8  ;;  %v1519_v55 = vmul.f32 %v3655_v52, %v1177_v1  ;;  %v5358_v63 = vld [vmem:[#allocation65_spill] sm:$0xff] }
 0x1dd   : > { %v1485_v37 = vadd.f32 %v5352_v10, %v1425_v54  ;;  %v5354_v26 = vrot.slane %v5353_v19, 1  ;;  %v5355_v25 = vrot.slane %v5344_v9, 1  ;;  %v1717_v7 = vmul.f32 %v3653_v50, %v5356_v20  ;;  %v5363_v20 = vld [vmem:[#allocation88_spill] sm:$0xff] }
 0x1de   : > { %v1864_v45 = vadd.f32 %v1836_v4, %v1804_v14  ;;  %v4624_v46 = vadd.f32 %v1329_v44, %v1297_v29  ;;  %v1426_v31 = vadd.f32 %v5357_v42, %v1354_v15  ;;  %v1954_v27 = vmul.f32 0.70710677, %v1898_v34  ;;  %v5359_v15 = vld [vmem:[#allocation75_spill] sm:$0xff] }
 0x1df   : > { %v1176_v51 = vsel %vm1163_vm3, %v5355_v25, %v5354_v26  ;;  %v1545_v8 = vadd.f32 %v1517_v43, %v1485_v37  ;;  %v1777_v39 = vmul.f32 %v3661_v56, %v5338_v53  ;;  %v1837_v54 = vmul.f32 %v3666_v60, %v1177_v1  ;;  %v5362_v37 = vld [vmem:[#allocation73_spill] sm:$0xff] }
 0x1e0   : > { %v1899_v9 = vadd.f32 %v4422_v59, %v1864_v45  ;;  %v1330_v35 = vmul.f32 %v3649_v48, %v1176_v51  ;;  %v1486_v4 = vadd.f32 %v5358_v63, %v1426_v31  ;;  %v1520_v44 = vmul.f32 %v3655_v52, %v1176_v51  ;;  %v5365_v63 = vld [vmem:[#allocation80_spill] sm:$0xff] }
 0x1e1   : > { %v4636_v14 = vmul.f32 0.5, %v1898_v34  ;;  %2937 = verf.f32 %v1954_v27  ;;  %v1745_v41 = vadd.f32 %v1717_v7, %v1545_v8  ;;  %v5360_v29 = vrot.slane %v5359_v15, 1  ;;  %v5364_v7 = vld [vmem:[#allocation71_spill] sm:$0xff] }
 0x1e2   : > { %v5361_v43 = vmov %v5354_v26  ;;  %v1955_v1 = vmul.f32 0.70710677, %v1899_v9  ;;  %v1546_v10 = vadd.f32 %v1518_v24, %v1486_v4  ;;  %v1718_v26 = vmul.f32 %v3653_v50, %v5362_v37  ;;  %v5367_v4 = vld [vmem:[#allocation66_spill] sm:$0xff] }
 0x1e3   : > { %v1175_v53 = vsel %vm1163_vm3, %v5361_v43, %v5360_v29  ;;  %v1805_v45 = vadd.f32 %v1777_v39, %v1745_v41  ;;  %v1358_v34 = vadd.f32 %v1330_v35, %v5363_v20  ;;  %v1838_v42 = vmul.f32 %v3666_v60, %v1176_v51  ;;  %v5366_v29 = vld [vmem:[#allocation76_spill] sm:$0xff] }
 0x1e4   : > { %v1331_v25 = vmul.f32 %v3649_v48, %v1175_v53  ;;  %v1427_v31 = vadd.f32 %v5364_v7, %v1355_v62  ;;  %v4650_v27 = vmul.f32 0.5, %v1899_v9  ;;  %2939 = verf.f32 %v1955_v1  ;;  %v5371_v62 = vld [vmem:[#allocation79_spill] sm:$0xff]  ;;  %v5372_v1 = vld [vmem:[#allocation72_spill] sm:$0xff] }
 0x1e5   : > { %v1746_v8 = vadd.f32 %v1718_v26, %v1546_v10  ;;  %v1299_v43 = vadd.f32 %v5366_v29, %v5365_v63  ;;  %v1865_v24 = vadd.f32 %v1837_v54, %v1805_v45  ;;  %v1521_v37 = vmul.f32 %v3655_v52, %v1175_v53  ;;  %v5373_v26 = vld [vmem:[#allocation81_spill] sm:$0xff] }
 0x1e6   : > { %v1487_v33 = vadd.f32 %v5367_v4, %v1427_v31  ;;  %v5369_v39 = vrot.slane %v5368_v22, 1  ;;  %v5370_v35 = vrot.slane %v5359_v15, 1  ;;  %v1719_v10 = vmul.f32 %v3653_v50, %v5372_v1  ;;  %v2934_v45 = vpop.eup %2933 }
 0x1e7   : > { %v1806_v9 = vadd.f32 %v5371_v62, %v1746_v8  ;;  %v4663_v41 = vadd.f32 %v1331_v25, %v1299_v43  ;;  %v1428_v54 = vadd.f32 %v5373_v26, %v1356_v2  ;;  %v1900_v20 = vadd.f32 %v4422_v59, %v1865_v24  ;;  %v2936_v63 = vpop.eup %2935  ;;  %v5374_v8 = vld [vmem:[#allocation78_spill] sm:$0xff]  ;;  %v5375_v2 = vld [vmem:[#allocation87_spill] sm:$0xff] }
 0x1e8   : > { %v1174_v51 = vsel %vm1163_vm3, %v5370_v35, %v5369_v39  ;;  %v1547_v7 = vadd.f32 %v1519_v55, %v1487_v33  ;;  %v1779_v31 = vmul.f32 %v3661_v56, %v5353_v19  ;;  %v1839_v15 = vmul.f32 %v3666_v60, %v1175_v53  ;;  %v5376_v19 = vld [vmem:[#allocation84_spill] sm:$0xff] }
 0x1e9   : > { %v2008_v29 = vadd.f32 1.0, %v2934_v45  ;;  %v1866_v4 = vadd.f32 %v1838_v42, %v1806_v9  ;;  %v1332_v25 = vmul.f32 %v3649_v48, %v1174_v51  ;;  %v1488_v43 = vadd.f32 %v5374_v8, %v1428_v54 }
 0x1ea   : > { %v2009_v39 = vadd.f32 1.0, %v2936_v63  ;;  %v1956_v35 = vmul.f32 0.70710677, %v1900_v20  ;;  %v1747_v62 = vadd.f32 %v1719_v10, %v1547_v7  ;;  %v1720_v1 = vmul.f32 %v3653_v50, %v5375_v2 }
 0x1eb   : > { %v2036_v24 = vmul.f32 %v2008_v29, %v1924_v23  ;;  %v1901_v33 = vadd.f32 %v4422_v59, %v1866_v4  ;;  %v1548_v55 = vadd.f32 %v1520_v44, %v1488_v43  ;;  %v5377_v26 = vrot.slane %v5376_v19, 1  ;;  %v5379_v4 = vld [vmem:[#allocation97_spill] sm:$0xff]  ;;  %v5380_v43 = vld [vmem:[#allocation82_spill] sm:$0xff] }
 0x1ec   : > { %v5378_v53 = vrot.slane %v5368_v22, 1  ;;  %v2037_v9 = vmul.f32 %v2009_v39, %v1925_v38  ;;  %2941 = verf.f32 %v1956_v35  ;;  %v1807_v54 = vadd.f32 %v1779_v31, %v1747_v62  ;;  %v5381_v31 = vld [vmem:[#allocation90_spill] sm:$0xff]  ;;  %v5382_v62 = vld [vmem:[#allocation92_spill] sm:$0xff] }
 0x1ed   : > { %v1522_v45 = vmul.f32 %v3655_v52, %v1174_v51  ;;  %2743 = vmatmul.mubr.f32.gmra.mxu1 %v2036_v24  ;;  %v1957_v10 = vmul.f32 0.70710677, %v1901_v33  ;;  %v1748_v7 = vadd.f32 %v1720_v1, %v1548_v55  ;;  %v1840_v23 = vmul.f32 %v3666_v60, %v1174_v51  ;;  %v5383_v1 = vld [vmem:[#allocation83_spill] sm:$0xff] }
 0x1ee   : > { %v1173_v42 = vsel %vm1163_vm3, %v5378_v53, %v5377_v26  ;;  %2745 = vmatprep.mubr.f32.mxu1 %v2037_v9  ;;  %v1928_v44 = vmul.f32 0.5, %v1900_v20  ;;  %v1867_v29 = vadd.f32 %v1839_v15, %v1807_v54  ;;  %v1360_v8 = vadd.f32 %v1332_v25, %v5379_v4  ;;  %v2938_v38 = vpop.eup %2937  ;;  %v5384_v26 = vld [vmem:[#allocation77_spill] sm:$0xff] }
 0x1ef   : > { %v1333_v63 = vmul.f32 %v3649_v48, %v1173_v42  ;;  %v1429_v2 = vadd.f32 %v5380_v43, %v4624_v46  ;;  %v4689_v39 = vmul.f32 0.5, %v1901_v33  ;;  %2943 = verf.f32 %v1957_v10  ;;  %v5385_v46 = vld [vmem:[#allocation86_spill] sm:$0xff]  ;;  %v5386_v9 = vld [vmem:[#allocation93_spill] sm:$0xff] }
 0x1f0   : > { %v1808_v35 = vadd.f32 %v5381_v31, %v1748_v7  ;;  %v1301_v24 = vadd.f32 %v5383_v1, %v5382_v62  ;;  %v2010_v51 = vadd.f32 1.0, %v2938_v38  ;;  %v1902_v55 = vadd.f32 %v4422_v59, %v1867_v29  ;;  %v5387_v38 = vld [vmem:[#allocation91_spill] sm:$0xff]  ;;  %v5390_v62 = vld [vmem:[#allocation89_spill] sm:$0xff]  ;;  %v5391_v1 = vld [vmem:[#allocation98_spill] sm:$0xff] }
 0x1f1   : > { %v1489_v20 = vadd.f32 %v5384_v26, %v1429_v2  ;;  %v1523_v15 = vmul.f32 %v3655_v52, %v1173_v42  ;;  %v1721_v33 = vmul.f32 %v3653_v50, %v5385_v46  ;;  %v1430_v54 = vadd.f32 %v5386_v9, %v1358_v34  ;;  %v2940_v10 = vpop.eup %2939  ;;  %v5392_v9 = vld [vmem:[#allocation95_spill] sm:$0xff] }
 0x1f2   : > { %v1868_v25 = vadd.f32 %v1840_v23, %v1808_v35  ;;  %v4697_v53 = vadd.f32 %v1333_v63, %v1301_v24  ;;  %v2038_v7 = vmul.f32 %v2010_v51, %v4636_v14  ;;  %v1958_v4 = vmul.f32 0.70710677, %v1902_v55 }
 0x1f3   : > { %v1549_v43 = vadd.f32 %v1521_v37, %v1489_v20  ;;  %v5388_v31 = vrot.slane %v5387_v38, 1  ;;  %v5389_v29 = vrot.slane %v5376_v19, 1  ;;  %v2011_v23 = vadd.f32 1.0, %v2940_v10  ;;  %v5395_v10 = vld [vmem:[#allocation96_spill] sm:$0xff] }
 0x1f4   : > { %v1903_v63 = vadd.f32 %v4422_v59, %v1868_v25  ;;  %v1781_v35 = vmul.f32 %v3661_v56, %v5368_v22  ;;  %v1490_v34 = vadd.f32 %v5390_v62, %v1430_v54  ;;  %2746 = vmatmul.mubr.f32.gmra.mxu1 %v2038_v7  ;;  %2945 = verf.f32 %v1958_v4  ;;  %v5398_v62 = vld [vmem:[#allocation102_spill] sm:$0xff] }
 0x1f5   : > { %v1172_v2 = vsel %vm1163_vm3, %v5389_v29, %v5388_v31  ;;  %v1749_v14 = vadd.f32 %v1721_v33, %v1549_v43  ;;  %v1841_v37 = vmul.f32 %v3666_v60, %v1173_v42  ;;  %v1722_v24 = vmul.f32 %v3653_v50, %v5391_v1 }
 0x1f6   : > { %v2039_v19 = vmul.f32 %v2011_v23, %v4650_v27  ;;  %v4717_v51 = vmul.f32 0.5, %v1902_v55  ;;  %v1959_v26 = vmul.f32 0.70710677, %v1903_v63  ;;  %v1334_v20 = vmul.f32 %v3649_v48, %v1172_v2 }
 0x1f7   : > { %v1809_v25 = vadd.f32 %v1781_v35, %v1749_v14  ;;  %v1524_v22 = vmul.f32 %v3655_v52, %v1172_v2  ;;  %v1550_v46 = vadd.f32 %v1522_v45, %v1490_v34  ;;  %v5393_v54 = vrot.slane %v5392_v9, 1  ;;  %v5396_v45 = vld [vmem:[#allocation111_spill] sm:$0xff]  ;;  %v5397_v35 = vld [vmem:[#allocation104_spill] sm:$0xff]  ;;  %v5399_v14 = vld [vmem:[#allocation85_spill] sm:$0xff] }
 0x1f8   : > { %v5394_v33 = vmov %v5388_v31  ;;  %2748 = vmatprep.mubr.f32.mxu1 %v2039_v19  ;;  %2947 = verf.f32 %v1959_v26  ;;  %v1842_v27 = vmul.f32 %v3666_v60, %v1172_v2  ;;  %v1431_v7 = vadd.f32 %v5395_v10, %v4663_v41  ;;  %v5400_v2 = vld [vmem:[#allocation100_spill] sm:$0xff] }
 0x1f9   : > { %v1171_v42 = vsel %vm1163_vm3, %v5394_v33, %v5393_v54  ;;  %v4731_v4 = vmul.f32 0.5, %v1903_v63  ;;  %v1869_v43 = vadd.f32 %v1841_v37, %v1809_v25  ;;  %v1362_v31 = vadd.f32 %v1334_v20, %v5396_v45  ;;  %v2942_v23 = vpop.eup %2941  ;;  %v5401_v63 = vld [vmem:[#allocation101_spill] sm:$0xff]  ;;  %v5402_v37 = vld [vmem:[#allocation94_spill] sm:$0xff] }
 0x1fa   : > { %v1335_v55 = vmul.f32 %v3649_v48, %v1171_v42  ;;  %v1750_v29 = vadd.f32 %v1722_v24, %v1550_v46  ;;  %v1303_v34 = vadd.f32 %v5398_v62, %v5397_v35  ;;  %v1491_v1 = vadd.f32 %v5399_v14, %v1431_v7  ;;  %v5405_v45 = vld [vmem:[#allocation105_spill] sm:$0xff] }
 0x1fb   : > { %v1525_v19 = vmul.f32 %v3655_v52, %v1171_v42  ;;  %v1723_v26 = vmul.f32 %v3653_v50, %v5400_v2  ;;  %v2012_v54 = vadd.f32 1.0, %v2942_v23  ;;  %v1904_v41 = vadd.f32 %v4422_v59, %v1869_v43 }
 0x1fc   : > { %v1810_v33 = vadd.f32 %v5401_v63, %v1750_v29  ;;  %v5403_v25 = vrot.slane %v5402_v37, 1  ;;  %v5404_v24 = vrot.slane %v5392_v9, 1  ;;  %v4748_v46 = vadd.f32 %v1335_v55, %v1303_v34  ;;  %v2944_v23 = vpop.eup %2943  ;;  %v5407_v55 = vld [vmem:[#allocation109_spill] sm:$0xff] }
 0x1fd   : > { %v1551_v10 = vadd.f32 %v1523_v15, %v1491_v1  ;;  %v1783_v7 = vmul.f32 %v3661_v56, %v5387_v38  ;;  %v1432_v35 = vadd.f32 %v5405_v45, %v1360_v8  ;;  %v2040_v62 = vmul.f32 %v2012_v54, %v1928_v44  ;;  %v5412_v45 = vld [vmem:[#allocation112_spill] sm:$0xff] }
 0x1fe   : > { %v1170_v20 = vsel %vm1163_vm3, %v5404_v24, %v5403_v25  ;;  %v1960_v43 = vmul.f32 0.70710677, %v1904_v41  ;;  %v1870_v14 = vadd.f32 %v1842_v27, %v1810_v33  ;;  %v1843_v29 = vmul.f32 %v3666_v60, %v1171_v42  ;;  %v5408_v42 = vld [vmem:[#allocation110_spill] sm:$0xff]  ;;  %v5411_v24 = vld [vmem:[#allocation119_spill] sm:$0xff] }
 0x1ff   : > { %v2013_v2 = vadd.f32 1.0, %v2944_v23  ;;  %v1751_v63 = vadd.f32 %v1723_v26, %v1551_v10  ;;  %v1336_v9 = vmul.f32 %v3649_v48, %v1170_v20  ;;  %v1492_v25 = vadd.f32 %v5406_v57, %v1432_v35  ;;  %2749 = vmatmul.mubr.f32.gmra.mxu1 %v2040_v62 }
 0x200   : > { %2949 = verf.f32 %v1960_v43  ;;  %v1905_v15 = vadd.f32 %v4422_v59, %v1870_v14  ;;  %v1526_v38 = vmul.f32 %v3655_v52, %v1170_v20  ;;  %v1724_v8 = vmul.f32 %v3653_v50, %v5407_v55  ;;  %v5414_v43 = vld [vmem:[#allocation106_spill] sm:$0xff] }
 0x201   : > { %v2041_v44 = vmul.f32 %v2013_v2, %v4689_v39  ;;  %v1811_v27 = vadd.f32 %v1783_v7, %v1751_v63  ;;  %v1552_v34 = vadd.f32 %v1524_v22, %v1492_v25  ;;  %v5409_v1 = vrot.slane %v5408_v42, 1  ;;  %v2946_v23 = vpop.eup %2945  ;;  %v5413_v7 = vld [vmem:[#allocation115_spill] sm:$0xff] }
 0x202   : > { %v5410_v26 = vrot.slane %v5402_v37, 1  ;;  %v1932_v54 = vmul.f32 0.5, %v1904_v41  ;;  %v1961_v33 = vmul.f32 0.70710677, %v1905_v15  ;;  %v1364_v10 = vadd.f32 %v1336_v9, %v5411_v24  ;;  %v5415_v41 = vld [vmem:[#allocation103_spill] sm:$0xff] }
 0x203   : > { %v1433_v35 = vadd.f32 %v5412_v45, %v4697_v53  ;;  %2751 = vmatprep.mubr.f32.mxu1 %v2041_v44  ;;  %v1871_v62 = vadd.f32 %v1843_v29, %v1811_v27  ;;  %v1752_v39 = vadd.f32 %v1724_v8, %v1552_v34  ;;  %v1844_v22 = vmul.f32 %v3666_v60, %v1170_v20  ;;  %v5416_v53 = vld [vmem:[#allocation117_spill] sm:$0xff]  ;;  %v5417_v27 = vld [vmem:[#allocation108_spill] sm:$0xff] }
 0x204   : > { %v1169_v57 = vsel %vm1163_vm3, %v5410_v26, %v5409_v1  ;;  %v1305_v14 = vadd.f32 %v5414_v43, %v5413_v7  ;;  %v2014_v2 = vadd.f32 1.0, %v2946_v23  ;;  %2951 = verf.f32 %v1961_v33  ;;  %v5418_v26 = vld [vmem:[#allocation116_spill] sm:$0xff] }
 0x205   : > { %v1337_v63 = vmul.f32 %v3649_v48, %v1169_v57  ;;  %v1493_v25 = vadd.f32 %v5415_v41, %v1433_v35  ;;  %v4775_v55 = vmul.f32 0.5, %v1905_v15  ;;  %v1906_v9 = vadd.f32 %v4422_v59, %v1871_v62  ;;  %v2948_v8 = vpop.eup %2947  ;;  %v5419_v15 = vld [vmem:[#allocation114_spill] sm:$0xff] }
 0x206   : > { %v1812_v1 = vadd.f32 %v5416_v53, %v1752_v39  ;;  %v1527_v29 = vmul.f32 %v3655_v52, %v1169_v57  ;;  %v2042_v20 = vmul.f32 %v2014_v2, %v4717_v51  ;;  %v1725_v34 = vmul.f32 %v3653_v50, %v5417_v27 }
 0x207   : > { %v1553_v44 = vadd.f32 %v1525_v19, %v1493_v25  ;;  %v1434_v33 = vadd.f32 %v5418_v26, %v1362_v31  ;;  %v2015_v24 = vadd.f32 1.0, %v2948_v8  ;;  %v1962_v45 = vmul.f32 0.70710677, %v1906_v9  ;;  %v5422_v19 = vld [vmem:[#allocation113_spill] sm:$0xff] }
 0x208   : > { %v1872_v35 = vadd.f32 %v1844_v22, %v1812_v1  ;;  %v5420_v23 = vrot.slane %v5419_v15, 1  ;;  %v5421_v62 = vrot.slane %v5408_v42, 1  ;;  %2752 = vmatmul.mubr.f32.gmra.mxu1 %v2042_v20  ;;  %v1365_v7 = vadd.f32 %v1337_v63, %v1305_v14  ;;  %v5423_v1 = vld [vmem:[#allocation120_spill] sm:$0xff]  ;;  %v5424_v20 = vld [vmem:[#allocation121_spill] sm:$0xff] }
 0x209   : > { %v1753_v43 = vadd.f32 %v1725_v34, %v1553_v44  ;;  %v1785_v51 = vmul.f32 %v3661_v56, %v5402_v37  ;;  %v1494_v2 = vadd.f32 %v5422_v19, %v1434_v33  ;;  %v2043_v31 = vmul.f32 %v2015_v24, %v4731_v4  ;;  %v5427_v34 = vld [vmem:[#allocation133_spill] sm:$0xff] }
 0x20a   : > { %v1168_v39 = vsel %vm1163_vm3, %v5421_v62, %v5420_v23  ;;  %2953 = verf.f32 %v1962_v45  ;;  %v1907_v22 = vadd.f32 %v4422_v59, %v1872_v35  ;;  %v1845_v41 = vmul.f32 %v3666_v60, %v1169_v57 }
 0x20b   : > { %v1813_v25 = vadd.f32 %v1785_v51, %v1753_v43  ;;  %v1338_v42 = vmul.f32 %v3649_v48, %v1168_v39  ;;  %v1554_v53 = vadd.f32 %v1526_v38, %v1494_v2  ;;  %v1726_v14 = vmul.f32 %v3653_v50, %v5423_v1  ;;  %2754 = vmatprep.mubr.f32.mxu1 %v2043_v31  ;;  %v5428_v38 = vld [vmem:[#allocation118_spill] sm:$0xff]  ;;  %v5429_v51 = vld [vmem:[#allocation124_spill] sm:$0xff]  ;;  %v5431_v31 = vld [vmem:[#allocation125_spill] sm:$0xff] }
 0x20c   : > { %v1934_v63 = vmul.f32 0.5, %v1906_v9  ;;  %v1963_v8 = vmul.f32 0.70710677, %v1907_v22  ;;  %v1528_v37 = vmul.f32 %v3655_v52, %v1168_v39  ;;  %v5425_v44 = vrot.slane %v5424_v20, 1  ;;  %v5430_v2 = vld [vmem:[#allocation128_spill] sm:$0xff]  ;;  %v5434_v1 = vld [vmem:[#allocation127_spill] sm:$0xff] }
 0x20d   : > { %v5426_v4 = vmov %v5420_v23  ;;  %v1873_v57 = vadd.f32 %v1845_v41, %v1813_v25  ;;  %v1366_v26 = vadd.f32 %v1338_v42, %v5427_v34  ;;  %v1754_v33 = vadd.f32 %v1726_v14, %v1554_v53  ;;  %v2950_v45 = vpop.eup %2949  ;;  %v5432_v25 = vld [vmem:[#allocation107_spill] sm:$0xff]  ;;  %v5433_v53 = vld [vmem:[#allocation122_spill] sm:$0xff] }
 0x20e   : > { %v1167_v27 = vsel %vm1163_vm3, %v5426_v4, %v5425_v44  ;;  %v1435_v24 = vadd.f32 %v5428_v38, %v4748_v46  ;;  %v4809_v35 = vmul.f32 0.5, %v1907_v22  ;;  %2955 = verf.f32 %v1963_v8 }
 0x20f   : > { %v1846_v9 = vmul.f32 %v3666_v60, %v1168_v39  ;;  %v1339_v23 = vmul.f32 %v3649_v48, %v1167_v27  ;;  %v2016_v62 = vadd.f32 1.0, %v2950_v45  ;;  %v1908_v43 = vadd.f32 %v4422_v59, %v1873_v57 }
 0x210   : > { %v1814_v19 = vadd.f32 %v5429_v51, %v1754_v33  ;;  %v1307_v41 = vadd.f32 %v5431_v31, %v5430_v2  ;;  %v1495_v42 = vadd.f32 %v5432_v25, %v1435_v24  ;;  %v1529_v46 = vmul.f32 %v3655_v52, %v1167_v27  ;;  %v5435_v33 = vld [vmem:[#allocation123_spill] sm:$0xff] }
 0x211   : > { %v1727_v22 = vmul.f32 %v3653_v50, %v5433_v53  ;;  %v1436_v14 = vadd.f32 %v5434_v1, %v1364_v10  ;;  %v2044_v39 = vmul.f32 %v2016_v62, %v1932_v54  ;;  %v1964_v8 = vmul.f32 0.70710677, %v1908_v43  ;;  %v2952_v4 = vpop.eup %2951  ;;  %v5440_v1 = vld [vmem:[#allocation136_spill] sm:$0xff] }
 0x212   : > { %v1874_v20 = vadd.f32 %v1846_v9, %v1814_v19  ;;  %v1787_v44 = vmul.f32 %v3661_v56, %v5419_v15  ;;  %v1367_v57 = vadd.f32 %v1339_v23, %v1307_v41  ;;  %v1555_v34 = vadd.f32 %v1527_v29, %v1495_v42  ;;  %v5438_v23 = vld [vmem:[#allocation131_spill] sm:$0xff]  ;;  %v5439_v19 = vld [vmem:[#allocation129_spill] sm:$0xff] }
 0x213   : > { %v1496_v38 = vadd.f32 %v5435_v33, %v1436_v14  ;;  %v5436_v24 = vrot.slane %v4353_v16, 1  ;;  %v5437_v45 = vrot.slane %v4200_v40, 1  ;;  %2755 = vmatmul.mubr.f32.gmra.mxu1 %v2044_v39  ;;  %v2017_v10 = vadd.f32 1.0, %v2952_v4  ;;  %v5441_v39 = vld [vmem:[#allocation126_spill] sm:$0xff] }
 0x214   : > { %2957 = verf.f32 %v1964_v8  ;;  %v1909_v54 = vadd.f32 %v4422_v59, %v1874_v20  ;;  %v1847_v9 = vmul.f32 %v3666_v60, %v1167_v27  ;;  %v1755_v15 = vadd.f32 %v1727_v22, %v1555_v34  ;;  %v5442_v8 = vld [vmem:[#allocation139_spill] sm:$0xff] }
 0x215   : > { %v1165_v51 = vsel %vm1163_vm3, %v5437_v45, %v5436_v24  ;;  %v1556_v62 = vadd.f32 %v1528_v37, %v1496_v38  ;;  %v1728_v29 = vmul.f32 %v3653_v50, %v5438_v23  ;;  %v1437_v2 = vadd.f32 %v5439_v19, %v1365_v7  ;;  %v5443_v7 = vld [vmem:[#allocation134_spill] sm:$0xff] }
 0x216   : > { %v2045_v16 = vmul.f32 %v2017_v10, %v4775_v55  ;;  %v1936_v31 = vmul.f32 0.5, %v1908_v43  ;;  %v1965_v41 = vmul.f32 0.70710677, %v1909_v54  ;;  %v1341_v25 = vmul.f32 %v3649_v48, %v1165_v51  ;;  %v5444_v55 = vld [vmem:[#allocation130_spill] sm:$0xff]  ;;  %v5446_v10 = vld [vmem:[#allocation140_spill] sm:$0xff] }
 0x217   : > { %v1815_v42 = vadd.f32 %v1787_v44, %v1755_v15  ;;  %v1756_v53 = vadd.f32 %v1728_v29, %v1556_v62  ;;  %v1848_v14 = vmul.f32 %v3666_v60, %v5440_v1  ;;  %v1497_v27 = vadd.f32 %v5441_v39, %v1437_v2  ;;  %v2954_v22 = vpop.eup %2953  ;;  %v5445_v44 = vld [vmem:[#allocation138_spill] sm:$0xff]  ;;  %v5447_v2 = vld [vmem:[#allocation137_spill] sm:$0xff]  ;;  %v5450_v39 = vld [vmem:[#allocation135_spill] sm:$0xff] }
 0x218   : > { %2757 = vmatprep.mubr.f32.mxu1 %v2045_v16  ;;  %v4841_v37 = vmul.f32 0.5, %v1909_v54  ;;  %2959 = verf.f32 %v1965_v41  ;;  %v1309_v20 = vadd.f32 %v5443_v7, %v5442_v8  ;;  %v1729_v43 = vmul.f32 %v3653_v50, %v5444_v55  ;;  %v5448_v41 = vld [vmem:[#allocation141_spill] sm:$0xff] }
 0x219   : > { %v2018_v4 = vadd.f32 1.0, %v2954_v22  ;;  %v1875_v48 = vadd.f32 %v1847_v9, %v1815_v42  ;;  %v1816_v34 = vadd.f32 %v5445_v44, %v1756_v53  ;;  %v1557_v33 = vadd.f32 %v1529_v46, %v1497_v27 }
 0x21a   : > { %v1369_v38 = vadd.f32 %v1341_v25, %v1309_v20  ;;  %v1531_v24 = vmul.f32 %v3655_v52, %v1165_v51  ;;  %v1789_v45 = vmul.f32 %v3661_v56, %v4200_v40  ;;  %v1438_v54 = vadd.f32 %v5446_v10, %v1366_v26  ;;  %v5453_v10 = vld [vmem:[#allocation32_spill] sm:$0xff] }
 0x21b   : > { %v2046_v15 = vmul.f32 %v2018_v4, %v1934_v63  ;;  %v4853_v62 = vadd.f32 %v4422_v59, %v1875_v48  ;;  %v1876_v23 = vadd.f32 %v1848_v14, %v1816_v34  ;;  %v1757_v29 = vadd.f32 %v1729_v43, %v1557_v33  ;;  %v2956_v19 = vpop.eup %2955  ;;  %v5451_v34 = vld [vmem:[#allocation132_spill] sm:$0xff] }
 0x21c   : > { %v1849_v9 = vmul.f32 %v3666_v60, %v1165_v51  ;;  %v1498_v16 = vadd.f32 %v5447_v2, %v1438_v54  ;;  %v1530_v46 = vmul.f32 %v3655_v52, %v5440_v1  ;;  %v1439_v25 = vadd.f32 %v5448_v41, %v1367_v57 }
 0x21d   : > { %2758 = vmatmul.mubr.f32.gmra.mxu1 %v2046_v15  ;;  %v2019_v40 = vadd.f32 1.0, %v2956_v19  ;;  %v1966_v26 = vmul.f32 0.70710677, %v4853_v62  ;;  %v4862_v63 = vadd.f32 %v4422_v59, %v1876_v23  ;;  %v1730_v42 = vmul.f32 %v3653_v50, %v4384_v12 }
 0x21e   : > { %v1817_v53 = vadd.f32 %v1789_v45, %v1757_v29  ;;  %v1558_v14 = vadd.f32 %v1530_v46, %v1498_v16  ;;  %v5449_v51 = vrot.slane %v4460_v47, 1  ;;  %v1499_v57 = vadd.f32 %v5450_v39, %v1439_v25 }
 0x21f   : > { %v2047_v27 = vmul.f32 %v2019_v40, %v4809_v35  ;;  %2961 = verf.f32 %v1966_v26  ;;  %v1967_v22 = vmul.f32 0.70710677, %v4862_v63  ;;  %v1850_v8 = vmul.f32 %v3666_v60, %v4405_v30 }
 0x220   : > { %v1382_v1 = vsel %vm1163_vm3, %v4307_v61, %v5449_v51  ;;  %v1877_v7 = vadd.f32 %v1849_v9, %v1817_v53  ;;  %v1758_v12 = vadd.f32 %v1730_v42, %v1558_v14  ;;  %v1559_v20 = vadd.f32 %v1531_v24, %v1499_v57  ;;  %v5452_v24 = vld [vmem:[#allocation142_spill] sm:$0xff]  ;;  %v5454_v9 = vld [vmem:[#allocation29_spill] sm:$0xff] }
 0x221   : > { %v1731_v47 = vmul.f32 %v3653_v50, %v4378_v58  ;;  %v2958_v55 = vpop.eup %2957  ;;  %2760 = vmatprep.mubr.f32.mxu1 %v2047_v27  ;;  %2963 = verf.f32 %v1967_v22  ;;  %v1533_v61 = vmul.f32 %v3655_v52, %v1382_v1  ;;  %v1852_v35 = vmul.f32 %v3666_v60, %v4510_v49  ;;  %v5456_v53 = vld [vmem:[#allocation30_spill] sm:$0xff] }
 0x222   : > { %v1441_v43 = vadd.f32 %v4439_v0, %v1369_v38  ;;  %v2020_v4 = vadd.f32 1.0, %v2958_v55  ;;  %v4883_v48 = vadd.f32 %v4422_v59, %v1877_v7  ;;  %v1818_v30 = vadd.f32 %v4394_v13, %v1758_v12  ;;  %v5461_v55 = vld [vmem:[#allocation143_spill] sm:$0xff] }
 0x223   : > { %v1759_v44 = vadd.f32 %v1731_v47, %v1559_v20  ;;  %v1791_v58 = vmul.f32 %v3661_v56, %v5451_v34  ;;  %v1880_v33 = vadd.f32 %v1852_v35, %v4557_v6  ;;  %v1476_v54 = vadd.f32 %v5453_v10, %v4503_v18  ;;  %v5458_v20 = vld [vmem:[#allocation35_spill] sm:$0xff]  ;;  %v5460_v47 = vld [vmem:[#allocation145_spill] sm:$0xff] }
 0x224   : > { %v1501_v45 = vadd.f32 %v5452_v24, %v1441_v43  ;;  %v2048_v49 = vmul.f32 %v2020_v4, %v1936_v31  ;;  %v1968_v0 = vmul.f32 0.70710677, %v4883_v48  ;;  %v1878_v38 = vadd.f32 %v1850_v8, %v1818_v30  ;;  %v5455_v31 = vld [vmem:[#allocation33_spill] sm:$0xff] }
 0x225   : > { %v1851_v15 = vmul.f32 %v3666_v60, %v1382_v1  ;;  %v2960_v23 = vpop.eup %2959  ;;  %v1819_v29 = vadd.f32 %v1791_v58, %v1759_v44  ;;  %v4895_v13 = vadd.f32 %v4422_v59, %v1880_v33  ;;  %v1677_v6 = vsel %vm1163_vm3, %v4456_v3, %v5454_v9  ;;  %v5463_v44 = vld [vmem:[#allocation37_spill] sm:$0xff]  ;;  %v5464_v33 = vld [vmem:[#allocation39_spill] sm:$0xff] }
 0x226   : > { %v1561_v19 = vadd.f32 %v1533_v61, %v1501_v45  ;;  %2761 = vmatmul.mubr.f32.gmra.mxu1 %v2048_v49  ;;  %v2021_v2 = vadd.f32 1.0, %v2960_v23  ;;  %2965 = verf.f32 %v1968_v0  ;;  %v4902_v18 = vadd.f32 %v4422_v59, %v1878_v38 }
 0x227   : > { %v1536_v16 = vadd.f32 %v5455_v31, %v1476_v54  ;;  %v1562_v46 = vadd.f32 %v4529_v36, %v4536_v11  ;;  %v1879_v41 = vadd.f32 %v1851_v15, %v1819_v29  ;;  %v1971_v25 = vmul.f32 0.70710677, %v4895_v13 }
 0x228   : > { %v1761_v40 = vadd.f32 %v4532_v5, %v1561_v19  ;;  %v2049_v26 = vmul.f32 %v2021_v2, %v4841_v37  ;;  %v1969_v3 = vmul.f32 0.70710677, %v4902_v18  ;;  %v1853_v42 = vmul.f32 %v3666_v60, %v1677_v6  ;;  %v5457_v37 = vld [vmem:[#allocation144_spill] sm:$0xff]  ;;  %v5465_v2 = vld [vmem:[#allocation31_spill] sm:$0xff] }
 0x229   : > { %v1647_v14 = vsel %vm1106_vm2, %v3630_v32, %v5456_v53  ;;  %v4917_v51 = vadd.f32 %v4422_v59, %v1879_v41  ;;  %2967 = verf.f32 %v1971_v25  ;;  %v1535_v5 = vmul.f32 %v3655_v52, %v4494_v17  ;;  %v5459_v52 = vld [vmem:[#allocation34_spill] sm:$0xff] }
 0x22a   : > { %v1821_v36 = vadd.f32 %v4473_v28, %v1761_v40  ;;  %v1708_v11 = vmul.f32 %v3653_v50, %v1647_v14  ;;  %2763 = vmatprep.mubr.f32.mxu1 %v2049_v26  ;;  %2969 = verf.f32 %v1969_v3  ;;  %v1734_v1 = vmul.f32 %v3653_v50, %v5457_v37 }
 0x22b   : > { %v1794_v39 = vmul.f32 0.0, %v3661_v56  ;;  %v1938_v57 = vmul.f32 0.5, %v4853_v62  ;;  %v1970_v27 = vmul.f32 0.70710677, %v4917_v51  ;;  %v1854_v12 = vmul.f32 %v3666_v60, %v5454_v9  ;;  %v5462_v62 = vld [vmem:[#allocation36_spill] sm:$0xff] }
 0x22c   : > { %v1881_v22 = vadd.f32 %v1853_v42, %v1821_v36  ;;  %v1736_v8 = vadd.f32 %v1708_v11, %v1536_v16  ;;  %v2962_v7 = vpop.eup %2961  ;;  %v1762_v28 = vadd.f32 %v1734_v1, %v1562_v46  ;;  %v1797_v17 = vadd.f32 %v5459_v52, %v5458_v20 }
 0x22d   : > { %v1503_v61 = vadd.f32 %v5461_v55, %v5460_v47  ;;  %v2022_v35 = vadd.f32 1.0, %v2962_v7  ;;  %2971 = verf.f32 %v1970_v27  ;;  %v1939_v30 = vmul.f32 0.5, %v4862_v63 }
 0x22e   : > { %v1916_v56 = vadd.f32 %v4422_v59, %v1881_v22  ;;  %v1796_v43 = vadd.f32 %v5462_v62, %v1736_v8  ;;  %v2964_v4 = vpop.eup %2963  ;;  %v1828_v34 = vmul.f32 %v3666_v60, %v5463_v44  ;;  %v1822_v58 = vadd.f32 %v1794_v39, %v1762_v28 }
 0x22f   : > { %v1857_v24 = vadd.f32 %v5464_v33, %v1797_v17  ;;  %v2050_v45 = vmul.f32 %v2022_v35, %v1938_v57  ;;  %v2023_v10 = vadd.f32 1.0, %v2964_v4  ;;  %v1563_v49 = vadd.f32 %v1535_v5, %v1503_v61 }
 0x230   : > { %v1972_v54 = vmul.f32 0.70710677, %v1916_v56  ;;  %v1856_v0 = vadd.f32 %v1828_v34, %v1796_v43  ;;  %v1882_v38 = vadd.f32 %v1854_v12, %v1822_v58  ;;  %v1735_v23 = vmul.f32 %v3653_v50, %v3630_v32  ;;  %v4960_v58 = vld [vmem:[%s5466_s29] ss:$0 sm:$0xff] }
 0x231   : > { %v1892_v15 = vadd.f32 %v4422_v59, %v1857_v24  ;;  %2764 = vmatmul.mubr.f32.gmra.mxu1 %v2050_v45  ;;  %v2051_v29 = vmul.f32 %v2023_v10, %v1939_v30  ;;  %v1703_v31 = vsel %vm1163_vm3, %v5454_v9, %v5465_v2  ;;  %v1940_v41 = vmul.f32 0.5, %v4883_v48  ;;  %v2983_v48 = vld [vmem:[%s5083_s6] ss:$0 sm:$0xff] }
 0x232   : > { %2973 = verf.f32 %v1972_v54  ;;  %v1891_v63 = vadd.f32 %v4422_v59, %v1856_v0  ;;  %v1917_v19 = vadd.f32 %v4422_v59, %v1882_v38  ;;  %v1763_v46 = vadd.f32 %v1735_v23, %v1563_v49 }
 0x233   : > { %v1948_v6 = vmul.f32 0.70710677, %v1892_v15  ;;  %v2966_v16 = vpop.eup %2965  ;;  %2766 = vmatprep.mubr.f32.mxu1 %v2051_v29  ;;  %v1855_v26 = vmul.f32 %v3666_v60, %v1703_v31  ;;  %v1941_v21 = vmul.f32 0.5, %v4902_v18  ;;  %v1943_v60 = vmul.f32 0.5, %v4895_v13 }
 0x234   : > { %v2024_v25 = vadd.f32 1.0, %v2966_v16  ;;  %v1947_v32 = vmul.f32 0.70710677, %v1891_v63  ;;  %v1973_v50 = vmul.f32 0.70710677, %v1917_v19  ;;  %v1823_v40 = vadd.f32 %v1794_v39, %v1763_v46 }
 0x235   : > { %2975 = verf.f32 %v1948_v6  ;;  %v1942_v37 = vmul.f32 0.5, %v4917_v51  ;;  %v1944_v22 = vmul.f32 0.5, %v1916_v56  ;;  %v1919_v13 = vmul.f32 0.5, %v1891_v63 }
 0x236   : > { %v2968_v3 = vpop.eup %2967  ;;  %v2052_v59 = vmul.f32 %v2024_v25, %v1940_v41  ;;  %2977 = verf.f32 %v1947_v32  ;;  %v1883_v53 = vadd.f32 %v1855_v26, %v1823_v40  ;;  %v1945_v51 = vmul.f32 0.5, %v1917_v19 }
 0x237   : > { %v2970_v42 = vpop.eup %2969  ;;  %2979 = verf.f32 %v1973_v50  ;;  %v2027_v14 = vadd.f32 1.0, %v2968_v3  ;;  %v1920_v55 = vmul.f32 0.5, %v1892_v15 }
 0x238   : > { %2767 = vmatmul.mubr.f32.gmra.mxu1 %v2052_v59  ;;  %v2025_v9 = vadd.f32 1.0, %v2970_v42  ;;  %v1918_v36 = vadd.f32 %v2983_v48, %v1883_v53 }
 0x239   : > { %v2055_v57 = vmul.f32 %v2027_v14, %v1943_v60 }
 0x23a   : > { %v2972_v11 = vpop.eup %2971  ;;  %v2053_v5 = vmul.f32 %v2025_v9, %v1941_v21  ;;  %v1974_v39 = vmul.f32 0.70710677, %v1918_v36  ;;  %v1946_v43 = vmul.f32 0.5, %v1918_v36 }
 0x23b   : > { %v2026_v1 = vadd.f32 1.0, %v2972_v11 }
 0x23c   : > { %2769 = vmatprep.mubr.f32.mxu1 %v2053_v5  ;;  %2981 = verf.f32 %v1974_v39 }
 0x23d   : > { %v2054_v27 = vmul.f32 %v2026_v1, %v1942_v37 }
 0x23f   : > { %v2974_v18 = vpop.eup %2973  ;;  %2770 = vmatmul.mubr.f32.gmra.mxu1 %v2054_v27 }
 0x240   : > { %v2028_v8 = vadd.f32 1.0, %v2974_v18  ;;  %2772 = vmatprep.mubr.f32.mxu1 %v2055_v57 }
 0x242   : > { %v2056_v7 = vmul.f32 %v2028_v8, %v1944_v22  ;;  %v2976_v28 = vpop.eup %2975 }
 0x243   : > { %v2978_v12 = vpop.eup %2977  ;;  %v2004_v20 = vadd.f32 1.0, %v2976_v28 }
 0x244   : > { %2773 = vmatmul.mubr.f32.gmra.mxu1 %v2056_v7  ;;  %v2980_v52 = vpop.eup %2979  ;;  %v2003_v17 = vadd.f32 1.0, %v2978_v12 }
 0x245   : > { %v2029_v47 = vadd.f32 1.0, %v2980_v52  ;;  %v2032_v62 = vmul.f32 %v2004_v20, %v1920_v55 }
 0x246   : > { %v2031_v61 = vmul.f32 %v2003_v17, %v1919_v13 }
 0x247   : > { %v2057_v35 = vmul.f32 %v2029_v47, %v1945_v51 }
 0x248   : > { %2736 = vmatprep.mubr.f32.mxu0 %v2031_v61 }
 0x249   : > { %2775 = vmatprep.mubr.f32.mxu1 %v2057_v35  ;;  %2737 = vmatmul.mubr.f32.vlgmr.msra.gmra.mxu0 %v2032_v62  ;;  %v2982_v56 = vpop.eup %2981 }
 0x24a   : > { %v2030_v4 = vadd.f32 1.0, %v2982_v56 }
 0x24c   : > { %v2058_v30 = vmul.f32 %v2030_v4, %v1946_v43 }
 0x24e   : > { %2776 = vmatmul.mubr.f32.gmra.mxu1 %v2058_v30 }
 0x27d   : > { %v2703_v44 = vpop.f32.mrf.mxu0 }
 0x27f   : > { %v957_v34 = vpop.f32.mrf.mxu0 }
 0x296   : > { %v2741_v33 = vpop.f32.mrf.mxu1 }
 0x297   : > { %v2164_v24 = vadd.f32 %v2741_v33, %v4960_v58 }
 0x298   : > { %v2158_v45 = vpop.f32.mrf.mxu1 }
 0x299   : > { %2290 = vst [vmem:[%s4965_s24 + $0x18] sm:$0xff] %v2164_v24  ;;  %v2159_v10 = vadd.f32 %v4960_v58, %v2158_v45 }
 0x29b   : > { %2289 = vst [vmem:[%s4965_s24 + $0x10] sm:$0xff] %v2159_v10 }
 0x2ad   : > { %v2744_v54 = vpop.f32.mrf.mxu1 }
 0x2ae   : > { %v2174_v49 = vadd.f32 %v2744_v54, %v4960_v58 }
 0x2af   : > { %v2168_v0 = vpop.f32.mrf.mxu1 }
 0x2b0   : > { %2292 = vst [vmem:[%s4965_s24 + $0x28] sm:$0xff] %v2174_v49  ;;  %v2169_v38 = vadd.f32 %v4960_v58, %v2168_v0 }
 0x2b2   : > { %2291 = vst [vmem:[%s4965_s24 + $0x20] sm:$0xff] %v2169_v38 }
 0x2b4   : > { %v2747_v15 = vpop.f32.mrf.mxu1 }
 0x2b5   : > { %v2184_v23 = vadd.f32 %v2747_v15, %v4960_v58 }
 0x2b6   : > { %v2178_v29 = vpop.f32.mrf.mxu1 }
 0x2b7   : > { %2294 = vst [vmem:[%s4965_s24 + $0x38] sm:$0xff] %v2184_v23  ;;  %v2179_v63 = vadd.f32 %v4960_v58, %v2178_v29 }
 0x2b9   : > { %2293 = vst [vmem:[%s4965_s24 + $0x30] sm:$0xff] %v2179_v63 }
 0x2bf   : > { %v2750_v19 = vpop.f32.mrf.mxu1 }
 0x2c0   : > { %v2194_v6 = vadd.f32 %v2750_v19, %v4960_v58 }
 0x2c1   : > { %v2188_v2 = vpop.f32.mrf.mxu1 }
 0x2c2   : > { %2296 = vst [vmem:[%s4965_s24 + $0x48] sm:$0xff] %v2194_v6  ;;  %v2189_v31 = vadd.f32 %v4960_v58, %v2188_v2 }
 0x2c4   : > { %2295 = vst [vmem:[%s4965_s24 + $0x40] sm:$0xff] %v2189_v31 }
 0x2c8   : > { %v2753_v16 = vpop.f32.mrf.mxu1 }
 0x2c9   : > { %v2204_v46 = vadd.f32 %v2753_v16, %v4960_v58 }
 0x2ca   : > { %v2198_v41 = vpop.f32.mrf.mxu1 }
 0x2cb   : > { %2298 = vst [vmem:[%s4965_s24 + $0x58] sm:$0xff] %v2204_v46  ;;  %v2199_v25 = vadd.f32 %v4960_v58, %v2198_v41 }
 0x2cd   : > { %2297 = vst [vmem:[%s4965_s24 + $0x50] sm:$0xff] %v2199_v25 }
 0x2d3   : > { %v2756_v32 = vpop.f32.mrf.mxu1 }
 0x2d4   : > { %v2214_v50 = vadd.f32 %v2756_v32, %v4960_v58 }
 0x2d5   : > { %v2208_v40 = vpop.f32.mrf.mxu1 }
 0x2d6   : > { %2300 = vst [vmem:[%s4965_s24 + $0x68] sm:$0xff] %v2214_v50  ;;  %v2209_v26 = vadd.f32 %v4960_v58, %v2208_v40 }
 0x2d8   : > { %2299 = vst [vmem:[%s4965_s24 + $0x60] sm:$0xff] %v2209_v26 }
 0x2dd   : > { %v2759_v3 = vpop.f32.mrf.mxu1 }
 0x2de   : > { %v2224_v59 = vadd.f32 %v2759_v3, %v4960_v58 }
 0x2df   : > { %v2218_v42 = vpop.f32.mrf.mxu1 }
 0x2e0   : > { %2302 = vst [vmem:[%s4965_s24 + $0x78] sm:$0xff] %v2224_v59  ;;  %v2219_v53 = vadd.f32 %v4960_v58, %v2218_v42 }
 0x2e2   : > { %2301 = vst [vmem:[%s4965_s24 + $0x70] sm:$0xff] %v2219_v53 }
 0x2e6   : > { %v2762_v21 = vpop.f32.mrf.mxu1 }
 0x2e7   : > { %v2234_v9 = vadd.f32 %v2762_v21, %v4960_v58 }
 0x2e8   : > { %v2228_v14 = vpop.f32.mrf.mxu1 }
 0x2e9   : > { %2304 = vst [vmem:[%s4965_s24 + $0x88] sm:$0xff] %v2234_v9  ;;  %v2229_v48 = vadd.f32 %v4960_v58, %v2228_v14 }
 0x2eb   : > { %2303 = vst [vmem:[%s4965_s24 + $0x80] sm:$0xff] %v2229_v48 }
 0x2f1   : > { %v2765_v36 = vpop.f32.mrf.mxu1 }
 0x2f2   : > { %v2244_v11 = vadd.f32 %v2765_v36, %v4960_v58 }
 0x2f3   : > { %v2238_v5 = vpop.f32.mrf.mxu1 }
 0x2f4   : > { %2306 = vst [vmem:[%s4965_s24 + $0x98] sm:$0xff] %v2244_v11  ;;  %v2239_v60 = vadd.f32 %v4960_v58, %v2238_v5 }
 0x2f6   : > { %2305 = vst [vmem:[%s4965_s24 + $0x90] sm:$0xff] %v2239_v60 }
 0x2f8   : > { %v2768_v37 = vpop.f32.mrf.mxu1 }
 0x2f9   : > { %v2254_v1 = vadd.f32 %v2768_v37, %v4960_v58 }
 0x2fa   : > { %v2248_v39 = vpop.f32.mrf.mxu1 }
 0x2fb   : > { %2308 = vst [vmem:[%s4965_s24 + $0xa8] sm:$0xff] %v2254_v1  ;;  %v2249_v57 = vadd.f32 %v4960_v58, %v2248_v39 }
 0x2fd   : > { %2307 = vst [vmem:[%s4965_s24 + $0xa0] sm:$0xff] %v2249_v57 }
 0x2ff   : > { %v2771_v27 = vpop.f32.mrf.mxu1 }
 0x300   : > { %v2264_v18 = vadd.f32 %v2771_v27, %v4960_v58 }
 0x301   : > { %v2258_v22 = vpop.f32.mrf.mxu1 }
 0x302   : > { %2310 = vst [vmem:[%s4965_s24 + $0xb8] sm:$0xff] %v2264_v18  ;;  %v2259_v8 = vadd.f32 %v4960_v58, %v2258_v22 }
 0x304   : > { %v2774_v7 = vpop.f32.mrf.mxu1  ;;  %2309 = vst [vmem:[%s4965_s24 + $0xb0] sm:$0xff] %v2259_v8 }
 0x305   : > { %v2274_v28 = vadd.f32 %v2774_v7, %v4960_v58 }
 0x306   : > { %v2268_v12 = vpop.f32.mrf.mxu1 }
 0x307   : > { %2312 = vst [vmem:[%s4965_s24 + $0xc8] sm:$0xff] %v2274_v28  ;;  %v2269_v20 = vadd.f32 %v4960_v58, %v2268_v12 }
 0x309   : > { %2311 = vst [vmem:[%s4965_s24 + $0xc0] sm:$0xff] %v2269_v20  ;;  %v2738_v52 = vpop.f32.mrf.mxu0 }
 0x30a   : > { %v2154_v13 = vadd.f32 %v2738_v52, %v4960_v58 }
 0x30b   : > { %v2148_v17 = vpop.f32.mrf.mxu0 }
 0x30c   : > { %2288 = vst [vmem:[%s4965_s24 + $0x8] sm:$0xff] %v2154_v13  ;;  %v2149_v51 = vadd.f32 %v4960_v58, %v2148_v17 }
 0x30e   : > { %2287 = vst [vmem:[%s4965_s24] sm:$0xff] %v2149_v51  ;;  %v2777_v47 = vpop.f32.mrf.mxu1 }
 0x30f   : > { %v2284_v55 = vadd.f32 %v2777_v47, %v4960_v58 }
 0x310   : > { %v2278_v61 = vpop.f32.mrf.mxu1 }
 0x311   : > { %2314 = vst [vmem:[%s4965_s24 + $0xd8] sm:$0xff] %v2284_v55  ;;  %v2279_v35 = vadd.f32 %v4960_v58, %v2278_v61 }
 0x313   : > { %2313 = vst [vmem:[%s4965_s24 + $0xd0] sm:$0xff] %v2279_v35 }
 0x314   : > { %3159 = shalt.err (!%p3156_p4)
}
 0x315   : > { %s3160_s19 = scalar_lea.hbm %s5024_s30, 3584  ;;  %s3164_s23 = scalar_lea.hbm %s5470_s22, 7168 }
 0x316   : > { %p3161_p2 = scmp.ne.s32.totalorder %s5024_s30, %s3160_s19  ;;  %p3165_p9 = scmp.lt.s32.totalorder %s5024_s30, %s5470_s22 }
 0x317   : > { %p3166_p5 = scmp.lt.s32.totalorder %s3164_s23, %s3160_s19 }
 0x318   : > { %p3162_p10 = pnand %p3161_p2, %p3356_p8 }
 0x319   : > { %p3167_p11 = por %p3166_p5, %p3165_p9 }
 0x31a   : > { %p3163_p12 = pneg %p3162_p10 }
 0x31c   : > { %p3168_p7 = pnand %p3167_p11, %p3163_p12 }
 0x31e   : > { %3171 = shalt.err (!%p3168_p7)
}
 0x31f   : > { %s3252_s1 = smov 128   ;;  %s3253_s29 = smov 8  }
 0x320   : > { %2834 = dma.vmem_to_hbm [thread:$0]  (%p3356_p8), %s5028_s27, 3584, %s5024_s30, %s2316_s12, %s3252_s1, %s3252_s1, %s3253_s29  }
 0x321 PF: > { %s5471_s24 = sld [smem:[#allocation21_spill]]  ;;  %p5474_p3 = scmp.ge.s32.totalorder %s3238_s14, 2 }
 0x322   : > { %s5472_s8 = sld [smem:[#allocation26_spill]] }
 0x327   : > { %s2347_s21 = sand.u32 1, %s5471_s24  }
 0x328   : > { %p5473_p13 = scmp.ne.s32.totalorder %s5472_s8, 0  ;;  %s2348_s9 = scalar_lea.sflag [#allocation6], %s2347_s21 }
 0x32a   : > { %p2857_p0 = pnand %p5474_p3, %p5473_p13 }
 0x32c   : > { %p2858_p6 = pneg %p2857_p0 }
 0x32e   : > { %3213 = dma.done.wait (%p2858_p6), %s2348_s9, 3584  }
 0x32f   : > { %3215 = vsyncadd (%p2858_p6), %s2348_s9, 4294963712  ;;  %s30_s14 = sadd.s32 1, %s3238_s14   ;;  %s5475_s3 = sld [smem:[#allocation22_spill]] }
 0x330   : > { %p27_p1 = scmp.ge.s32.totalorder %s30_s14, 4   ;;  %s5476_s11 = sld [smem:[#allocation28_spill]] }
 0x331   : > { %s5477_s12 = sld [smem:[#allocation24_spill]]  ;;  %s5479_s30 = smov %s3222_s10 }
 0x332   : > { %s5478_s13 = sld [smem:[#allocation27_spill]]  ;;  %29 = sbr.rel (!%p27_p1) target bundleno = 16 (0x10), region = 141 }
 0x335   : > { %s5480_s10 = smov %s5475_s3 }
 0x337   :  { %2353 = vsyncpa [#allocation5], 1 }
 0x338   :  { %2355 = vsyncpa [#allocation5 + $0x1], 1 }
 0x339   :  { %2356 = vsyncpa [#allocation8], 1 }
 0x33a   :  { %2358 = vsyncpa [#allocation8 + $0x1], 1 }
 0x33b   :  { %2359 = vsyncpa [#allocation11], 1 }
 0x33c   :  { %2360 = vsyncpa [#allocation14], 1 }
 0x33d   :  { %2361 = vsyncpa [#allocation6], 1 }
 0x33e   :  { %2363 = vsyncpa [#allocation6 + $0x1], 1 }

</bundles_post_ra>
